<compile_context>
chip_gen: v7x
topology: tpu7x:2x2x1
jax: 0.10.0
libtpu: 0.0.40
codegen_flags: <defaults>
</compile_context>

<pallas_src>
import functools

import jax
import jax.numpy as jnp
from jax import lax
from jax.experimental import pallas as pl
from jax.experimental.pallas import tpu as pltpu

_LN_EPS = 1e-5
_SQRT_HALF = 0.7071067811865476


def _round_up(x, m):
    return ((x + m - 1) // m) * m


def _vmem_limit_bytes():
    """Scoped-VMEM budget: ~48 MiB on 128-MiB parts (v5e/v6e), ~38 MiB on v7x."""
    cap = 128 * 1024 * 1024
    try:
        info = pltpu.get_tpu_info()
        cap = int(getattr(info, "vmem_capacity_bytes", cap))
    except Exception:
        pass
    return int(min(48 * 1024 * 1024, 0.6 * cap))


def _compiler_params(semantics, vmem_limit):
    return pltpu.CompilerParams(dimension_semantics=semantics,
                                vmem_limit_bytes=vmem_limit)


def _pick_tile(total, desired, align=128):
    """Largest multiple of `align` <= desired that divides `total`; else full width."""
    if total <= desired:
        return total
    best = None
    t = align
    while t <= desired:
        if total % t == 0:
            best = t
        t += align
    return best if best is not None else total


def _padded_tile(total, desired, align=128):
    """Pad `total` to a multiple of `align`; return (padded_total, tile) with
    tile a multiple of `align`, <= desired, dividing padded_total."""
    total_p = _round_up(total, align)
    if total_p <= desired:
        return total_p, total_p
    best = align
    t = align
    while t <= desired:
        if total_p % t == 0:
            best = t
        t += align
    return total_p, best


def _layernorm_f32(x, gamma, beta, eps):
    mean = jnp.mean(x, axis=-1, keepdims=True)
    var = jnp.mean(jnp.square(x - mean), axis=-1, keepdims=True)
    return (x - mean) * lax.rsqrt(var + eps) * gamma + beta


# -----------------------------------------------------------------------------
# Kernels
# -----------------------------------------------------------------------------
def _ln_matmul_kernel(x_ref, g_ref, b_ref, w_ref, o_ref, xn_ref, *, eps):
    """out[i, j] = LayerNorm(x)[i] @ W[:, j]; LN cached in VMEM across j."""
    @pl.when(pl.program_id(1) == 0)
    def _():
        xn = _layernorm_f32(x_ref[...].astype(jnp.float32),
                            g_ref[...].astype(jnp.float32),
                            b_ref[...].astype(jnp.float32), eps)
        xn_ref[...] = xn.astype(xn_ref.dtype)

    o_ref[...] = jnp.dot(xn_ref[...], w_ref[...],
                         preferred_element_type=jnp.float32).astype(o_ref.dtype)


def _attn_kernel(qkv_ref, o_ref, *, heads, dim_head, inner, scale, compute_dtype):
    """Per batch: all heads of softmax(q @ k^T * scale) @ v, written lane-dense."""
    qkv = qkv_ref[0]                                   # (N, Wp), compute_dtype
    outs = []
    for h in range(heads):                             # static unroll over heads
        q = qkv[:, h * dim_head:(h + 1) * dim_head]
        k = qkv[:, inner + h * dim_head: inner + (h + 1) * dim_head]
        v = qkv[:, 2 * inner + h * dim_head: 2 * inner + (h + 1) * dim_head]
        s = lax.dot_general(q, k, (((1,), (1,)), ((), ())),
                            preferred_element_type=jnp.float32) * scale
        s = s - jnp.max(s, axis=-1, keepdims=True)
        p = jnp.exp(s)
        p = p * pl.reciprocal(jnp.sum(p, axis=-1, keepdims=True), approx=True)
        outs.append(jnp.dot(p.astype(compute_dtype), v,
                            preferred_element_type=jnp.float32))
    o_ref[0] = jnp.concatenate(outs, axis=-1).astype(o_ref.dtype)


def _matmul_residual_kernel(a_ref, w_ref, r_ref, o_ref, *, compute_dtype):
    """out = a @ W + residual."""
    acc = jnp.dot(a_ref[...].astype(compute_dtype), w_ref[...],
                  preferred_element_type=jnp.float32)
    o_ref[...] = (acc + r_ref[...].astype(jnp.float32)).astype(o_ref.dtype)


def _ffn_kernel(x_ref, g_ref, b_ref, w1_ref, b1_ref, w2_ref, b2_ref, o_ref,
                xn_ref, *, eps, compute_dtype):
    """out = GELU(LN(x) @ W1 + b1) @ W2 + b2 + x; hidden dim tiled on axis 1.
    Accumulates directly into the VMEM-resident output block (f32)."""
    k = pl.program_id(1)

    @pl.when(k == 0)
    def _():
        xn = _layernorm_f32(x_ref[...].astype(jnp.float32),
                            g_ref[...].astype(jnp.float32),
                            b_ref[...].astype(jnp.float32), eps)
        xn_ref[...] = xn.astype(xn_ref.dtype)
        o_ref[...] = x_ref[...].astype(jnp.float32) + b2_ref[...].astype(jnp.float32)

    h = jnp.dot(xn_ref[...], w1_ref[...],
                preferred_element_type=jnp.float32) + b1_ref[...].astype(jnp.float32)
    # Exact erf-based GELU (PyTorch nn.GELU default).
    h = 0.5 * h * (1.0 + lax.erf(h * _SQRT_HALF))
    o_ref[...] += jnp.dot(h.astype(compute_dtype), w2_ref[...],
                          preferred_element_type=jnp.float32)


def _ln_kernel(x_ref, g_ref, b_ref, o_ref, *, eps):
    o_ref[...] = _layernorm_f32(x_ref[...].astype(jnp.float32),
                                g_ref[...].astype(jnp.float32),
                                b_ref[...].astype(jnp.float32), eps).astype(o_ref.dtype)


# -----------------------------------------------------------------------------
# pallas_call wrappers
# -----------------------------------------------------------------------------
def _ln_matmul(x2, gamma, beta, w, *, eps, compute_dtype, tile_m, tile_n, vmem_limit):
    rows_p, dim = x2.shape
    out_w = w.shape[1]
    grid = (rows_p // tile_m, out_w // tile_n)
    return pl.pallas_call(
        functools.partial(_ln_matmul_kernel, eps=eps),
        out_shape=jax.ShapeDtypeStruct((rows_p, out_w), compute_dtype),
        grid_spec=pltpu.PrefetchScalarGridSpec(
            num_scalar_prefetch=0,
            grid=grid,
            in_specs=[
                pl.BlockSpec((tile_m, dim), lambda i, j: (i, 0)),
                pl.BlockSpec((1, dim), lambda i, j: (0, 0)),
                pl.BlockSpec((1, dim), lambda i, j: (0, 0)),
                pl.BlockSpec((dim, tile_n), lambda i, j: (0, j)),
            ],
            out_specs=pl.BlockSpec((tile_m, tile_n), lambda i, j: (i, j)),
            scratch_shapes=[pltpu.VMEM((tile_m, dim), compute_dtype)],  # cached LN(x)
        ),
        compiler_params=_compiler_params(("parallel", "arbitrary"), vmem_limit),
    )(x2,
      gamma.reshape(1, dim).astype(jnp.float32),
      beta.reshape(1, dim).astype(jnp.float32),
      w)


def _attention(qkv3, *, heads, dim_head, inner, scale, compute_dtype, vmem_limit):
    B, N, Wp = qkv3.shape
    return pl.pallas_call(
        functools.partial(_attn_kernel, heads=heads, dim_head=dim_head,
                          inner=inner, scale=scale, compute_dtype=compute_dtype),
        out_shape=jax.ShapeDtypeStruct((B, N, inner), compute_dtype),
        grid_spec=pltpu.PrefetchScalarGridSpec(
            num_scalar_prefetch=0,
            grid=(B,),
            in_specs=[pl.BlockSpec((1, N, Wp), lambda b: (b, 0, 0))],
            out_specs=pl.BlockSpec((1, N, inner), lambda b: (b, 0, 0)),
        ),
        compiler_params=_compiler_params(("parallel",), vmem_limit),
    )(qkv3)


def _matmul_residual(a, w, r, *, compute_dtype, tile_m, tile_n, vmem_limit):
    rows_p, k_in = a.shape
    out_w = w.shape[1]
    grid = (rows_p // tile_m, out_w // tile_n)
    return pl.pallas_call(
        functools.partial(_matmul_residual_kernel, compute_dtype=compute_dtype),
        out_shape=jax.ShapeDtypeStruct((rows_p, out_w), jnp.float32),
        grid_spec=pltpu.PrefetchScalarGridSpec(
            num_scalar_prefetch=0,
            grid=grid,
            in_specs=[
                pl.BlockSpec((tile_m, k_in), lambda i, j: (i, 0)),
                pl.BlockSpec((k_in, tile_n), lambda i, j: (0, j)),
                pl.BlockSpec((tile_m, tile_n), lambda i, j: (i, j)),
            ],
            out_specs=pl.BlockSpec((tile_m, tile_n), lambda i, j: (i, j)),
        ),
        compiler_params=_compiler_params(("parallel", "parallel"), vmem_limit),
    )(a, w, r)


def _ffn(x2, gamma, beta, w1, b1, w2, b2, *, eps, compute_dtype, tile_m, tile_h,
         vmem_limit):
    rows_p, dim = x2.shape
    hidden_p = w1.shape[1]
    grid = (rows_p // tile_m, hidden_p // tile_h)
    return pl.pallas_call(
        functools.partial(_ffn_kernel, eps=eps, compute_dtype=compute_dtype),
        out_shape=jax.ShapeDtypeStruct((rows_p, dim), jnp.float32),
        grid_spec=pltpu.PrefetchScalarGridSpec(
            num_scalar_prefetch=0,
            grid=grid,
            in_specs=[
                pl.BlockSpec((tile_m, dim), lambda i, k: (i, 0)),
                pl.BlockSpec((1, dim), lambda i, k: (0, 0)),
                pl.BlockSpec((1, dim), lambda i, k: (0, 0)),
                pl.BlockSpec((dim, tile_h), lambda i, k: (0, k)),
                pl.BlockSpec((1, tile_h), lambda i, k: (0, k)),
                pl.BlockSpec((tile_h, dim), lambda i, k: (k, 0)),
                pl.BlockSpec((1, dim), lambda i, k: (0, 0)),
            ],
            out_specs=pl.BlockSpec((tile_m, dim), lambda i, k: (i, 0)),
            scratch_shapes=[pltpu.VMEM((tile_m, dim), compute_dtype)],  # cached LN(x)
        ),
        compiler_params=_compiler_params(("parallel", "arbitrary"), vmem_limit),
    )(x2,
      gamma.reshape(1, dim).astype(jnp.float32),
      beta.reshape(1, dim).astype(jnp.float32),
      w1, b1.reshape(1, hidden_p).astype(jnp.float32),
      w2, b2.reshape(1, dim).astype(jnp.float32))


def _final_layernorm(x2, gamma, beta, *, eps, tile_m, vmem_limit):
    rows_p, dim = x2.shape
    return pl.pallas_call(
        functools.partial(_ln_kernel, eps=eps),
        out_shape=jax.ShapeDtypeStruct((rows_p, dim), jnp.float32),
        grid_spec=pltpu.PrefetchScalarGridSpec(
            num_scalar_prefetch=0,
            grid=(rows_p // tile_m,),
            in_specs=[
                pl.BlockSpec((tile_m, dim), lambda i: (i, 0)),
                pl.BlockSpec((1, dim), lambda i: (0, 0)),
                pl.BlockSpec((1, dim), lambda i: (0, 0)),
            ],
            out_specs=pl.BlockSpec((tile_m, dim), lambda i: (i, 0)),
        ),
        compiler_params=_compiler_params(("parallel",), vmem_limit),
    )(x2,
      gamma.reshape(1, dim).astype(jnp.float32),
      beta.reshape(1, dim).astype(jnp.float32))


# -----------------------------------------------------------------------------
# Full transformer forward
# -----------------------------------------------------------------------------
def transformer_forward(x, params, *, heads, dim_head,
                        tile_m=256, tile_n=512, tile_h=512,
                        eps=_LN_EPS, compute_dtype=jnp.bfloat16):
    """x: (B, N, dim) -> (B, N, dim).  Matches the PyTorch Transformer forward.

    On v6e (MXU-rich, 128 MiB VMEM) sweeping tile_m=512 / tile_n=tile_h=1024
    can improve the FLOPs-per-byte of the weight stream further.
    """
    B, N, dim = x.shape
    inner = heads * dim_head
    scale = float(dim_head) ** -0.5
    rows = B * N

    vmem_limit = _vmem_limit_bytes()
    if vmem_limit < 40 * 1024 * 1024:   # 64-MiB-VMEM parts (v7x): shrink hidden tile
        tile_h = min(tile_h, 256)

    tile_m = min(tile_m, _round_up(rows, 8))
    rows_p = _round_up(rows, tile_m)

    x2 = x.reshape(rows, dim).astype(jnp.float32)     # residual stream stays f32
    if rows_p != rows:
        x2 = jnp.pad(x2, ((0, rows_p - rows), (0, 0)))

    for layer in params["layers"]:
        # ---------------- Attention block:  x = to_out(attn(LN(x))) + x --------
        a = layer["attn"]
        w_qkv = a["w_qkv"].astype(compute_dtype)       # identity if pre-cast
        w_out = a["w_out"].astype(compute_dtype)

        qkv_w = w_qkv.shape[1]
        qkv_w_p, t_n = _padded_tile(qkv_w, tile_n)
        if qkv_w_p != qkv_w:                           # keep tile_n bounded
            w_qkv = jnp.pad(w_qkv, ((0, 0), (0, qkv_w_p - qkv_w)))

        qkv = _ln_matmul(x2, a["gamma"], a["beta"], w_qkv,
                         eps=eps, compute_dtype=compute_dtype,
                         tile_m=tile_m, tile_n=t_n, vmem_limit=vmem_limit)

        # Free reshape (contiguous) -> per-batch attention, all heads in-kernel.
        qkv3 = (qkv[:rows] if rows_p != rows else qkv).reshape(B, N, qkv_w_p)
        o = _attention(qkv3, heads=heads, dim_head=dim_head, inner=inner,
                       scale=scale, compute_dtype=compute_dtype,
                       vmem_limit=vmem_limit)
        o = o.reshape(rows, inner)
        if rows_p != rows:
            o = jnp.pad(o, ((0, rows_p - rows), (0, 0)))

        x2 = _matmul_residual(o, w_out, x2,
                              compute_dtype=compute_dtype, tile_m=tile_m,
                              tile_n=_pick_tile(dim, tile_n),
                              vmem_limit=vmem_limit)

        # ---------------- FeedForward block:  x = ff(x) + x ---------------------
        f = layer["ff"]
        w1 = f["w1"].astype(compute_dtype)
        w2 = f["w2"].astype(compute_dtype)
        b1 = f["b1"].astype(jnp.float32)
        hidden = w1.shape[1]
        hidden_p, t_h = _padded_tile(hidden, tile_h)
        if hidden_p != hidden:                         # zero-pad hidden: GELU(0)=0
            w1 = jnp.pad(w1, ((0, 0), (0, hidden_p - hidden)))
            b1 = jnp.pad(b1, ((0, hidden_p - hidden),))
            w2 = jnp.pad(w2, ((0, hidden_p - hidden), (0, 0)))

        x2 = _ffn(x2, f["gamma"], f["beta"], w1, b1, w2, f["b2"],
                  eps=eps, compute_dtype=compute_dtype,
                  tile_m=tile_m, tile_h=t_h, vmem_limit=vmem_limit)

    fin = params["final"]
    out = _final_layernorm(x2, fin["gamma"], fin["beta"], eps=eps,
                           tile_m=tile_m, vmem_limit=vmem_limit)
    return out[:rows].reshape(B, N, dim).astype(x.dtype)


def init_params(key, dim, depth, heads, dim_head, mlp_dim, dtype=jnp.float32):
    inner = heads * dim_head
    layers = []
    for _ in range(depth):
        key, k1, k2, k3, k4, k5, k6 = jax.random.split(key, 7)
        attn = dict(gamma=jnp.ones((dim,), dtype), beta=jnp.zeros((dim,), dtype),
                    w_qkv=jax.random.normal(k1, (dim, 3 * inner), dtype) * 0.05,
                    w_out=jax.random.normal(k2, (inner, dim), dtype) * 0.05)
        ff = dict(gamma=jnp.ones((dim,), dtype), beta=jnp.zeros((dim,), dtype),
                  w1=jax.random.normal(k3, (dim, mlp_dim), dtype) * 0.05,
                  b1=jax.random.normal(k4, (mlp_dim,), dtype) * 0.05,
                  w2=jax.random.normal(k5, (mlp_dim, dim), dtype) * 0.05,
                  b2=jax.random.normal(k6, (dim,), dtype) * 0.05)
        layers.append({"attn": attn, "ff": ff})
    final = dict(gamma=jnp.ones((dim,), dtype), beta=jnp.zeros((dim,), dtype))
    return {"layers": layers, "final": final}


def prepare_params(params, compute_dtype=jnp.bfloat16):
    """One-time pre-cast of the MXU weight matrices (call OUTSIDE the jit)."""
    def cast_layer(layer):
        a, f = layer["attn"], layer["ff"]
        return {"attn": dict(a, w_qkv=a["w_qkv"].astype(compute_dtype),
                             w_out=a["w_out"].astype(compute_dtype)),
                "ff": dict(f, w1=f["w1"].astype(compute_dtype),
                           w2=f["w2"].astype(compute_dtype))}
    return {"layers": [cast_layer(l) for l in params["layers"]],
            "final": params["final"]}


# -----------------------------------------------------------------------------
# Pure-JAX reference (mirrors the kernel's bf16-MXU / f32-accumulate choices)
# -----------------------------------------------------------------------------
def _reference(x, params, *, heads, dim_head, eps=_LN_EPS, compute_dtype=jnp.bfloat16):
    B, N, dim = x.shape
    inner = heads * dim_head
    scale = float(dim_head) ** -0.5

    def ln(v, g, b):
        vf = v.astype(jnp.float32)
        mu = jnp.mean(vf, axis=-1, keepdims=True)
        var = jnp.mean(jnp.square(vf - mu), axis=-1, keepdims=True)
        return (vf - mu) * lax.rsqrt(var + eps) * g + b

    def mm(a, w):
        return jnp.dot(a.astype(compute_dtype), w.astype(compute_dtype),
                       preferred_element_type=jnp.float32)

    h = x.astype(jnp.float32)
    for layer in params["layers"]:
        a = layer["attn"]
        xn = ln(h, a["gamma"], a["beta"])
        qkv = mm(xn, a["w_qkv"]).astype(compute_dtype).reshape(B, N, 3, heads, dim_head)
        q = jnp.transpose(qkv[:, :, 0], (0, 2, 1, 3))
        k = jnp.transpose(qkv[:, :, 1], (0, 2, 1, 3))
        v = jnp.transpose(qkv[:, :, 2], (0, 2, 1, 3))
        s = jnp.einsum("bhqd,bhkd->bhqk", q, k,
                       preferred_element_type=jnp.float32) * scale
        s = s - jnp.max(s, axis=-1, keepdims=True)
        p = jnp.exp(s)
        p = p / jnp.sum(p, axis=-1, keepdims=True)
        o = jnp.einsum("bhqk,bhkd->bhqd", p.astype(compute_dtype), v,
                       preferred_element_type=jnp.float32)
        o = jnp.transpose(o, (0, 2, 1, 3)).reshape(B, N, inner)
        h = mm(o, a["w_out"]) + h

        f = layer["ff"]
        xn = ln(h, f["gamma"], f["beta"])
        hid = mm(xn, f["w1"]) + f["b1"]
        hid = 0.5 * hid * (1.0 + lax.erf(hid * _SQRT_HALF))
        h = mm(hid, f["w2"]) + f["b2"] + h

    fin = params["final"]
    return ln(h, fin["gamma"], fin["beta"]).astype(x.dtype)


if __name__ == "__main__":
    # Small shapes consistent with the module, kept lane-dense (dim multiple of 128).
    B, N = 2, 16
    dim, depth, heads, dim_head, mlp_dim = 128, 2, 2, 64, 256

    key = jax.random.PRNGKey(0)
    kx, kp = jax.random.split(key)
    x = jax.random.normal(kx, (B, N, dim), dtype=jnp.float32)
    params = init_params(kp, dim, depth, heads, dim_head, mlp_dim)
    params_bf16 = prepare_params(params)   # one-time weight cast, outside the jit

    fwd = jax.jit(functools.partial(transformer_forward, heads=heads, dim_head=dim_head))
    y = jax.block_until_ready(fwd(x, params_bf16))

    y_ref = _reference(x, params, heads=heads, dim_head=dim_head)
    assert y.shape == (B, N, dim)
    max_err = float(jnp.max(jnp.abs(y - y_ref)))
    assert jnp.allclose(y, y_ref, atol=3e-2, rtol=3e-2), f"mismatch vs reference: {max_err}"

    print("KERNEL_OK")
</pallas_src>

<mosaic_0001>
module attributes {stable_mosaic.version = 11 : i64} {
  func.func @_attn_kernel(%arg0: i32, %arg1: memref<1x16x384xbf16, #tpu.memory_space<vmem>>, %arg2: memref<1x16x128xbf16, #tpu.memory_space<vmem>>) attributes {dimension_semantics = [#tpu.dimension_semantics<parallel>], iteration_bounds = array<i64: 2>, scalar_prefetch = 0 : i64, scratch_operands = 0 : i64, tpu.core_type = #tpu.core_type<tc>, window_params = [{transform_indices = @transform_0, window_bounds = array<i64: 1, 16, 384>}, {transform_indices = @transform_1, window_bounds = array<i64: 1, 16, 128>}]} {
    %c0 = arith.constant 0 : index
    %c0_0 = arith.constant 0 : index
    %c0_1 = arith.constant 0 : index
    %0 = vector.load %arg1[%c0, %c0_0, %c0_1] : memref<1x16x384xbf16, #tpu.memory_space<vmem>>, vector<1x16x384xbf16>
    %1 = vector.shape_cast %0 : vector<1x16x384xbf16> to vector<16x384xbf16>
    %2 = vector.extract_strided_slice %1 {offsets = [0, 0], sizes = [16, 64], strides = [1, 1]} : vector<16x384xbf16> to vector<16x64xbf16>
    %3 = vector.extract_strided_slice %1 {offsets = [0, 128], sizes = [16, 64], strides = [1, 1]} : vector<16x384xbf16> to vector<16x64xbf16>
    %4 = vector.extract_strided_slice %1 {offsets = [0, 256], sizes = [16, 64], strides = [1, 1]} : vector<16x384xbf16> to vector<16x64xbf16>
    %cst = arith.constant dense<0.000000e+00> : vector<16x16xf32>
    %5 = tpu.matmul %2, %3, %cst {dimension_numbers = #tpu.dot_dimension_numbers<[1], [1], [0], [0], [0, 0, 1, 0], [], []>} : vector<16x64xbf16>, vector<16x64xbf16>, vector<16x16xf32> -> vector<16x16xf32>
    %cst_2 = arith.constant 1.250000e-01 : f32
    %6 = vector.broadcast %cst_2 : f32 to vector<16x16xf32>
    %7 = arith.mulf %5, %6 : vector<16x16xf32>
    %cst_3 = arith.constant dense<0xFF800000> : vector<16xf32>
    %8 = vector.multi_reduction <maximumf>, %7, %cst_3 [1] : vector<16x16xf32> to vector<16xf32>
    %9 = vector.shape_cast %8 : vector<16xf32> to vector<16x1xf32>
    %10 = vector.broadcast %9 : vector<16x1xf32> to vector<16x16xf32>
    %11 = arith.subf %7, %10 : vector<16x16xf32>
    %12 = math.exp %11 : vector<16x16xf32>
    %cst_4 = arith.constant dense<0.000000e+00> : vector<16xf32>
    %13 = vector.multi_reduction <add>, %12, %cst_4 [1] : vector<16x16xf32> to vector<16xf32>
    %14 = vector.shape_cast %13 : vector<16xf32> to vector<16x1xf32>
    %15 = tpu.reciprocal %14 {approx = true} : vector<16x1xf32> -> vector<16x1xf32>
    %16 = vector.broadcast %15 : vector<16x1xf32> to vector<16x16xf32>
    %17 = arith.mulf %12, %16 : vector<16x16xf32>
    %18 = arith.truncf %17 : vector<16x16xf32> to vector<16x16xbf16>
    %cst_5 = arith.constant dense<0.000000e+00> : vector<16x64xf32>
    %19 = tpu.matmul %18, %4, %cst_5 {dimension_numbers = #tpu.dot_dimension_numbers<[1], [0], [0], [1], [0, 0, 1, 1], [], []>} : vector<16x16xbf16>, vector<16x64xbf16>, vector<16x64xf32> -> vector<16x64xf32>
    %20 = vector.extract_strided_slice %1 {offsets = [0, 64], sizes = [16, 64], strides = [1, 1]} : vector<16x384xbf16> to vector<16x64xbf16>
    %21 = vector.extract_strided_slice %1 {offsets = [0, 192], sizes = [16, 64], strides = [1, 1]} : vector<16x384xbf16> to vector<16x64xbf16>
    %22 = vector.extract_strided_slice %1 {offsets = [0, 320], sizes = [16, 64], strides = [1, 1]} : vector<16x384xbf16> to vector<16x64xbf16>
    %cst_6 = arith.constant dense<0.000000e+00> : vector<16x16xf32>
    %23 = tpu.matmul %20, %21, %cst_6 {dimension_numbers = #tpu.dot_dimension_numbers<[1], [1], [0], [0], [0, 0, 1, 0], [], []>} : vector<16x64xbf16>, vector<16x64xbf16>, vector<16x16xf32> -> vector<16x16xf32>
    %cst_7 = arith.constant 1.250000e-01 : f32
    %24 = vector.broadcast %cst_7 : f32 to vector<16x16xf32>
    %25 = arith.mulf %23, %24 : vector<16x16xf32>
    %cst_8 = arith.constant dense<0xFF800000> : vector<16xf32>
    %26 = vector.multi_reduction <maximumf>, %25, %cst_8 [1] : vector<16x16xf32> to vector<16xf32>
    %27 = vector.shape_cast %26 : vector<16xf32> to vector<16x1xf32>
    %28 = vector.broadcast %27 : vector<16x1xf32> to vector<16x16xf32>
    %29 = arith.subf %25, %28 : vector<16x16xf32>
    %30 = math.exp %29 : vector<16x16xf32>
    %cst_9 = arith.constant dense<0.000000e+00> : vector<16xf32>
    %31 = vector.multi_reduction <add>, %30, %cst_9 [1] : vector<16x16xf32> to vector<16xf32>
    %32 = vector.shape_cast %31 : vector<16xf32> to vector<16x1xf32>
    %33 = tpu.reciprocal %32 {approx = true} : vector<16x1xf32> -> vector<16x1xf32>
    %34 = vector.broadcast %33 : vector<16x1xf32> to vector<16x16xf32>
    %35 = arith.mulf %30, %34 : vector<16x16xf32>
    %36 = arith.truncf %35 : vector<16x16xf32> to vector<16x16xbf16>
    %cst_10 = arith.constant dense<0.000000e+00> : vector<16x64xf32>
    %37 = tpu.matmul %36, %22, %cst_10 {dimension_numbers = #tpu.dot_dimension_numbers<[1], [0], [0], [1], [0, 0, 1, 1], [], []>} : vector<16x16xbf16>, vector<16x64xbf16>, vector<16x64xf32> -> vector<16x64xf32>
    %38 = tpu.concatenate %19, %37 in 1 : vector<16x64xf32>, vector<16x64xf32> -> vector<16x128xf32>
    %39 = arith.truncf %38 : vector<16x128xf32> to vector<16x128xbf16>
    %c0_11 = arith.constant 0 : index
    %c0_12 = arith.constant 0 : index
    %c0_13 = arith.constant 0 : index
    %40 = vector.load %arg2[%c0_11, %c0_12, %c0_13] : memref<1x16x128xbf16, #tpu.memory_space<vmem>>, vector<1x16x128xbf16>
    %41 = vector.shape_cast %40 : vector<1x16x128xbf16> to vector<16x128xbf16>
    %42 = vector.shape_cast %39 : vector<16x128xbf16> to vector<1x16x128xbf16>
    tpu.vector_store %arg2[%c0_11, %c0_12, %c0_13], %42 {strides = array<i32>} : memref<1x16x128xbf16, #tpu.memory_space<vmem>>, vector<1x16x128xbf16>,
    return
  }
  func.func @transform_0(%arg0: i32) -> (i32, i32, i32) {
    %c0_i32 = arith.constant 0 : i32
    %c0_i32_0 = arith.constant 0 : i32
    %c0_i32_1 = arith.constant 0 : i32
    return %arg0, %c0_i32, %c0_i32_0 : i32, i32, i32
  }
  func.func @transform_1(%arg0: i32) -> (i32, i32, i32) {
    %c0_i32 = arith.constant 0 : i32
    %c0_i32_0 = arith.constant 0 : i32
    %c0_i32_1 = arith.constant 0 : i32
    return %arg0, %c0_i32, %c0_i32_0 : i32, i32, i32
  }
}

module attributes {stable_mosaic.version = 11 : i64} {
  func.func @_matmul_residual_kernel(%arg0: i32, %arg1: i32, %arg2: memref<32x128xbf16, #tpu.memory_space<vmem>>, %arg3: memref<128x128xbf16, #tpu.memory_space<vmem>>, %arg4: memref<32x128xf32, #tpu.memory_space<vmem>>, %arg5: memref<32x128xf32, #tpu.memory_space<vmem>>) attributes {dimension_semantics = [#tpu.dimension_semantics<parallel>, #tpu.dimension_semantics<parallel>], iteration_bounds = array<i64: 1, 1>, scalar_prefetch = 0 : i64, scratch_operands = 0 : i64, tpu.core_type = #tpu.core_type<tc>, window_params = [{transform_indices = @transform_0, window_bounds = array<i64: 32, 128>}, {transform_indices = @transform_1, window_bounds = array<i64: 128, 128>}, {transform_indices = @transform_2, window_bounds = array<i64: 32, 128>}, {transform_indices = @transform_3, window_bounds = array<i64: 32, 128>}]} {
    %c0 = arith.constant 0 : index
    %c0_0 = arith.constant 0 : index
    %0 = vector.load %arg2[%c0, %c0_0] : memref<32x128xbf16, #tpu.memory_space<vmem>>, vector<32x128xbf16>
    %c0_1 = arith.constant 0 : index
    %c0_2 = arith.constant 0 : index
    %1 = vector.load %arg3[%c0_1, %c0_2] : memref<128x128xbf16, #tpu.memory_space<vmem>>, vector<128x128xbf16>
    %cst = arith.constant dense<0.000000e+00> : vector<32x128xf32>
    %2 = tpu.matmul %0, %1, %cst {dimension_numbers = #tpu.dot_dimension_numbers<[1], [0], [0], [1], [0, 0, 1, 1], [], []>} : vector<32x128xbf16>, vector<128x128xbf16>, vector<32x128xf32> -> vector<32x128xf32>
    %c0_3 = arith.constant 0 : index
    %c0_4 = arith.constant 0 : index
    %3 = vector.load %arg4[%c0_3, %c0_4] : memref<32x128xf32, #tpu.memory_space<vmem>>, vector<32x128xf32>
    %4 = arith.addf %2, %3 : vector<32x128xf32>
    %c0_5 = arith.constant 0 : index
    %c0_6 = arith.constant 0 : index
    %5 = vector.load %arg5[%c0_5, %c0_6] : memref<32x128xf32, #tpu.memory_space<vmem>>, vector<32x128xf32>
    tpu.vector_store %arg5[%c0_5, %c0_6], %4 {strides = array<i32>} : memref<32x128xf32, #tpu.memory_space<vmem>>, vector<32x128xf32>,
    return
  }
  func.func @transform_0(%arg0: i32, %arg1: i32) -> (i32, i32) {
    %c0_i32 = arith.constant 0 : i32
    %c0_i32_0 = arith.constant 0 : i32
    return %arg0, %c0_i32 : i32, i32
  }
  func.func @transform_1(%arg0: i32, %arg1: i32) -> (i32, i32) {
    %c0_i32 = arith.constant 0 : i32
    %c0_i32_0 = arith.constant 0 : i32
    return %c0_i32, %arg1 : i32, i32
  }
  func.func @transform_2(%arg0: i32, %arg1: i32) -> (i32, i32) {
    %c0_i32 = arith.constant 0 : i32
    return %arg0, %arg1 : i32, i32
  }
  func.func @transform_3(%arg0: i32, %arg1: i32) -> (i32, i32) {
    %c0_i32 = arith.constant 0 : i32
    return %arg0, %arg1 : i32, i32
  }
}

module attributes {stable_mosaic.version = 11 : i64} {
  func.func @_ffn_kernel(%arg0: i32, %arg1: i32, %arg2: memref<32x128xf32, #tpu.memory_space<vmem>>, %arg3: memref<1x128xf32, #tpu.memory_space<vmem>>, %arg4: memref<1x128xf32, #tpu.memory_space<vmem>>, %arg5: memref<128x256xbf16, #tpu.memory_space<vmem>>, %arg6: memref<1x256xf32, #tpu.memory_space<vmem>>, %arg7: memref<256x128xbf16, #tpu.memory_space<vmem>>, %arg8: memref<1x128xf32, #tpu.memory_space<vmem>>, %arg9: memref<32x128xf32, #tpu.memory_space<vmem>>, %arg10: memref<32x128xbf16, #tpu.memory_space<vmem>>) attributes {dimension_semantics = [#tpu.dimension_semantics<parallel>, #tpu.dimension_semantics<arbitrary>], iteration_bounds = array<i64: 1, 1>, scalar_prefetch = 0 : i64, scratch_operands = 1 : i64, tpu.core_type = #tpu.core_type<tc>, window_params = [{transform_indices = @transform_0, window_bounds = array<i64: 32, 128>}, {pipeline_mode = #tpu.pipeline_mode<synchronous>, transform_indices = @transform_1, window_bounds = array<i64: 1, 128>}, {pipeline_mode = #tpu.pipeline_mode<synchronous>, transform_indices = @transform_2, window_bounds = array<i64: 1, 128>}, {transform_indices = @transform_3, window_bounds = array<i64: 128, 256>}, {transform_indices = @transform_4, window_bounds = array<i64: 1, 256>}, {transform_indices = @transform_5, window_bounds = array<i64: 256, 128>}, {pipeline_mode = #tpu.pipeline_mode<synchronous>, transform_indices = @transform_6, window_bounds = array<i64: 1, 128>}, {transform_indices = @transform_7, window_bounds = array<i64: 32, 128>}]} {
    %c0_i32 = arith.constant 0 : i32
    %0 = arith.cmpi eq, %arg1, %c0_i32 : i32
    %1 = arith.extui %0 : i1 to i32
    %c0_i32_0 = arith.constant 0 : i32
    %2 = arith.cmpi ne, %1, %c0_i32_0 : i32
    scf.if %2 {
      %c0_16 = arith.constant 0 : index
      %c0_17 = arith.constant 0 : index
      %23 = vector.load %arg2[%c0_16, %c0_17] : memref<32x128xf32, #tpu.memory_space<vmem>>, vector<32x128xf32>
      %c0_18 = arith.constant 0 : index
      %c0_19 = arith.constant 0 : index
      %24 = vector.load %arg3[%c0_18, %c0_19] : memref<1x128xf32, #tpu.memory_space<vmem>>, vector<1x128xf32>
      %c0_20 = arith.constant 0 : index
      %c0_21 = arith.constant 0 : index
      %25 = vector.load %arg4[%c0_20, %c0_21] : memref<1x128xf32, #tpu.memory_space<vmem>>, vector<1x128xf32>
      %cst_22 = arith.constant dense<0.000000e+00> : vector<32xf32>
      %26 = vector.multi_reduction <add>, %23, %cst_22 [1] : vector<32x128xf32> to vector<32xf32>
      %27 = vector.shape_cast %26 : vector<32xf32> to vector<32x1xf32>
      %cst_23 = arith.constant 1.280000e+02 : f32
      %28 = vector.broadcast %cst_23 : f32 to vector<32x1xf32>
      %29 = arith.divf %27, %28 : vector<32x1xf32>
      %30 = vector.broadcast %29 : vector<32x1xf32> to vector<32x128xf32>
      %31 = arith.subf %23, %30 : vector<32x128xf32>
      %32 = arith.mulf %31, %31 : vector<32x128xf32>
      %cst_24 = arith.constant dense<0.000000e+00> : vector<32xf32>
      %33 = vector.multi_reduction <add>, %32, %cst_24 [1] : vector<32x128xf32> to vector<32xf32>
      %34 = vector.shape_cast %33 : vector<32xf32> to vector<32x1xf32>
      %cst_25 = arith.constant 1.280000e+02 : f32
      %35 = vector.broadcast %cst_25 : f32 to vector<32x1xf32>
      %36 = arith.divf %34, %35 : vector<32x1xf32>
      %37 = vector.broadcast %29 : vector<32x1xf32> to vector<32x128xf32>
      %38 = arith.subf %23, %37 : vector<32x128xf32>
      %cst_26 = arith.constant 9.99999974E-6 : f32
      %39 = vector.broadcast %cst_26 : f32 to vector<32x1xf32>
      %40 = arith.addf %36, %39 : vector<32x1xf32>
      %41 = math.rsqrt %40 : vector<32x1xf32>
      %42 = vector.broadcast %41 : vector<32x1xf32> to vector<32x128xf32>
      %43 = arith.mulf %38, %42 : vector<32x128xf32>
      %44 = vector.broadcast %24 : vector<1x128xf32> to vector<32x128xf32>
      %45 = arith.mulf %43, %44 : vector<32x128xf32>
      %46 = vector.broadcast %25 : vector<1x128xf32> to vector<32x128xf32>
      %47 = arith.addf %45, %46 : vector<32x128xf32>
      %48 = arith.truncf %47 : vector<32x128xf32> to vector<32x128xbf16>
      %c0_27 = arith.constant 0 : index
      %c0_28 = arith.constant 0 : index
      %49 = vector.load %arg10[%c0_27, %c0_28] : memref<32x128xbf16, #tpu.memory_space<vmem>>, vector<32x128xbf16>
      tpu.vector_store %arg10[%c0_27, %c0_28], %48 {strides = array<i32>} : memref<32x128xbf16, #tpu.memory_space<vmem>>, vector<32x128xbf16>,
      %c0_29 = arith.constant 0 : index
      %c0_30 = arith.constant 0 : index
      %50 = vector.load %arg2[%c0_29, %c0_30] : memref<32x128xf32, #tpu.memory_space<vmem>>, vector<32x128xf32>
      %c0_31 = arith.constant 0 : index
      %c0_32 = arith.constant 0 : index
      %51 = vector.load %arg8[%c0_31, %c0_32] : memref<1x128xf32, #tpu.memory_space<vmem>>, vector<1x128xf32>
      %52 = vector.broadcast %51 : vector<1x128xf32> to vector<32x128xf32>
      %53 = arith.addf %50, %52 : vector<32x128xf32>
      %c0_33 = arith.constant 0 : index
      %c0_34 = arith.constant 0 : index
      %54 = vector.load %arg9[%c0_33, %c0_34] : memref<32x128xf32, #tpu.memory_space<vmem>>, vector<32x128xf32>
      tpu.vector_store %arg9[%c0_33, %c0_34], %53 {strides = array<i32>} : memref<32x128xf32, #tpu.memory_space<vmem>>, vector<32x128xf32>,
    } else {
    }
    %c0 = arith.constant 0 : index
    %c0_1 = arith.constant 0 : index
    %3 = vector.load %arg10[%c0, %c0_1] : memref<32x128xbf16, #tpu.memory_space<vmem>>, vector<32x128xbf16>
    %c0_2 = arith.constant 0 : index
    %c0_3 = arith.constant 0 : index
    %4 = vector.load %arg5[%c0_2, %c0_3] : memref<128x256xbf16, #tpu.memory_space<vmem>>, vector<128x256xbf16>
    %cst = arith.constant dense<0.000000e+00> : vector<32x256xf32>
    %5 = tpu.matmul %3, %4, %cst {dimension_numbers = #tpu.dot_dimension_numbers<[1], [0], [0], [1], [0, 0, 1, 1], [], []>} : vector<32x128xbf16>, vector<128x256xbf16>, vector<32x256xf32> -> vector<32x256xf32>
    %c0_4 = arith.constant 0 : index
    %c0_5 = arith.constant 0 : index
    %6 = vector.load %arg6[%c0_4, %c0_5] : memref<1x256xf32, #tpu.memory_space<vmem>>, vector<1x256xf32>
    %7 = vector.broadcast %6 : vector<1x256xf32> to vector<32x256xf32>
    %8 = arith.addf %5, %7 : vector<32x256xf32>
    %cst_6 = arith.constant 5.000000e-01 : f32
    %9 = vector.broadcast %cst_6 : f32 to vector<32x256xf32>
    %10 = arith.mulf %9, %8 : vector<32x256xf32>
    %cst_7 = arith.constant 0.707106769 : f32
    %11 = vector.broadcast %cst_7 : f32 to vector<32x256xf32>
    %12 = arith.mulf %8, %11 : vector<32x256xf32>
    %13 = math.erf %12 : vector<32x256xf32>
    %cst_8 = arith.constant 1.000000e+00 : f32
    %14 = vector.broadcast %cst_8 : f32 to vector<32x256xf32>
    %15 = arith.addf %14, %13 : vector<32x256xf32>
    %16 = arith.mulf %10, %15 : vector<32x256xf32>
    %c0_9 = arith.constant 0 : index
    %c0_10 = arith.constant 0 : index
    %17 = vector.load %arg9[%c0_9, %c0_10] : memref<32x128xf32, #tpu.memory_space<vmem>>, vector<32x128xf32>
    %18 = arith.truncf %16 : vector<32x256xf32> to vector<32x256xbf16>
    %c0_11 = arith.constant 0 : index
    %c0_12 = arith.constant 0 : index
    %19 = vector.load %arg7[%c0_11, %c0_12] : memref<256x128xbf16, #tpu.memory_space<vmem>>, vector<256x128xbf16>
    %cst_13 = arith.constant dense<0.000000e+00> : vector<32x128xf32>
    %20 = tpu.matmul %18, %19, %cst_13 {dimension_numbers = #tpu.dot_dimension_numbers<[1], [0], [0], [1], [0, 0, 1, 1], [], []>} : vector<32x256xbf16>, vector<256x128xbf16>, vector<32x128xf32> -> vector<32x128xf32>
    %21 = arith.addf %17, %20 : vector<32x128xf32>
    %c0_14 = arith.constant 0 : index
    %c0_15 = arith.constant 0 : index
    %22 = vector.load %arg9[%c0_14, %c0_15] : memref<32x128xf32, #tpu.memory_space<vmem>>, vector<32x128xf32>
    tpu.vector_store %arg9[%c0_14, %c0_15], %21 {strides = array<i32>} : memref<32x128xf32, #tpu.memory_space<vmem>>, vector<32x128xf32>,
    return
  }
  func.func @transform_0(%arg0: i32, %arg1: i32) -> (i32, i32) {
    %c0_i32 = arith.constant 0 : i32
    %c0_i32_0 = arith.constant 0 : i32
    return %arg0, %c0_i32 : i32, i32
  }
  func.func @transform_1(%arg0: i32, %arg1: i32) -> (i32, i32) {
    %c0_i32 = arith.constant 0 : i32
    %c0_i32_0 = arith.constant 0 : i32
    %c0_i32_1 = arith.constant 0 : i32
    return %c0_i32, %c0_i32_0 : i32, i32
  }
  func.func @transform_2(%arg0: i32, %arg1: i32) -> (i32, i32) {
    %c0_i32 = arith.constant 0 : i32
    %c0_i32_0 = arith.constant 0 : i32
    %c0_i32_1 = arith.constant 0 : i32
    return %c0_i32, %c0_i32_0 : i32, i32
  }
  func.func @transform_3(%arg0: i32, %arg1: i32) -> (i32, i32) {
    %c0_i32 = arith.constant 0 : i32
    %c0_i32_0 = arith.constant 0 : i32
    return %c0_i32, %arg1 : i32, i32
  }
  func.func @transform_4(%arg0: i32, %arg1: i32) -> (i32, i32) {
    %c0_i32 = arith.constant 0 : i32
    %c0_i32_0 = arith.constant 0 : i32
    return %c0_i32, %arg1 : i32, i32
  }
  func.func @transform_5(%arg0: i32, %arg1: i32) -> (i32, i32) {
    %c0_i32 = arith.constant 0 : i32
    %c0_i32_0 = arith.constant 0 : i32
    return %arg1, %c0_i32 : i32, i32
  }
  func.func @transform_6(%arg0: i32, %arg1: i32) -> (i32, i32) {
    %c0_i32 = arith.constant 0 : i32
    %c0_i32_0 = arith.constant 0 : i32
    %c0_i32_1 = arith.constant 0 : i32
    return %c0_i32, %c0_i32_0 : i32, i32
  }
  func.func @transform_7(%arg0: i32, %arg1: i32) -> (i32, i32) {
    %c0_i32 = arith.constant 0 : i32
    %c0_i32_0 = arith.constant 0 : i32
    return %arg0, %c0_i32 : i32, i32
  }
}

module attributes {stable_mosaic.version = 11 : i64} {
  func.func @_ln_matmul_kernel(%arg0: i32, %arg1: i32, %arg2: memref<32x128xf32, #tpu.memory_space<vmem>>, %arg3: memref<1x128xf32, #tpu.memory_space<vmem>>, %arg4: memref<1x128xf32, #tpu.memory_space<vmem>>, %arg5: memref<128x384xbf16, #tpu.memory_space<vmem>>, %arg6: memref<32x384xbf16, #tpu.memory_space<vmem>>, %arg7: memref<32x128xbf16, #tpu.memory_space<vmem>>) attributes {dimension_semantics = [#tpu.dimension_semantics<parallel>, #tpu.dimension_semantics<arbitrary>], iteration_bounds = array<i64: 1, 1>, scalar_prefetch = 0 : i64, scratch_operands = 1 : i64, tpu.core_type = #tpu.core_type<tc>, window_params = [{transform_indices = @transform_0, window_bounds = array<i64: 32, 128>}, {pipeline_mode = #tpu.pipeline_mode<synchronous>, transform_indices = @transform_1, window_bounds = array<i64: 1, 128>}, {pipeline_mode = #tpu.pipeline_mode<synchronous>, transform_indices = @transform_2, window_bounds = array<i64: 1, 128>}, {transform_indices = @transform_3, window_bounds = array<i64: 128, 384>}, {transform_indices = @transform_4, window_bounds = array<i64: 32, 384>}]} {
    %c0_i32 = arith.constant 0 : i32
    %0 = arith.cmpi eq, %arg1, %c0_i32 : i32
    %1 = arith.extui %0 : i1 to i32
    %c0_i32_0 = arith.constant 0 : i32
    %2 = arith.cmpi ne, %1, %c0_i32_0 : i32
    scf.if %2 {
      %c0_6 = arith.constant 0 : index
      %c0_7 = arith.constant 0 : index
      %8 = vector.load %arg2[%c0_6, %c0_7] : memref<32x128xf32, #tpu.memory_space<vmem>>, vector<32x128xf32>
      %c0_8 = arith.constant 0 : index
      %c0_9 = arith.constant 0 : index
      %9 = vector.load %arg3[%c0_8, %c0_9] : memref<1x128xf32, #tpu.memory_space<vmem>>, vector<1x128xf32>
      %c0_10 = arith.constant 0 : index
      %c0_11 = arith.constant 0 : index
      %10 = vector.load %arg4[%c0_10, %c0_11] : memref<1x128xf32, #tpu.memory_space<vmem>>, vector<1x128xf32>
      %cst_12 = arith.constant dense<0.000000e+00> : vector<32xf32>
      %11 = vector.multi_reduction <add>, %8, %cst_12 [1] : vector<32x128xf32> to vector<32xf32>
      %12 = vector.shape_cast %11 : vector<32xf32> to vector<32x1xf32>
      %cst_13 = arith.constant 1.280000e+02 : f32
      %13 = vector.broadcast %cst_13 : f32 to vector<32x1xf32>
      %14 = arith.divf %12, %13 : vector<32x1xf32>
      %15 = vector.broadcast %14 : vector<32x1xf32> to vector<32x128xf32>
      %16 = arith.subf %8, %15 : vector<32x128xf32>
      %17 = arith.mulf %16, %16 : vector<32x128xf32>
      %cst_14 = arith.constant dense<0.000000e+00> : vector<32xf32>
      %18 = vector.multi_reduction <add>, %17, %cst_14 [1] : vector<32x128xf32> to vector<32xf32>
      %19 = vector.shape_cast %18 : vector<32xf32> to vector<32x1xf32>
      %cst_15 = arith.constant 1.280000e+02 : f32
      %20 = vector.broadcast %cst_15 : f32 to vector<32x1xf32>
      %21 = arith.divf %19, %20 : vector<32x1xf32>
      %22 = vector.broadcast %14 : vector<32x1xf32> to vector<32x128xf32>
      %23 = arith.subf %8, %22 : vector<32x128xf32>
      %cst_16 = arith.constant 9.99999974E-6 : f32
      %24 = vector.broadcast %cst_16 : f32 to vector<32x1xf32>
      %25 = arith.addf %21, %24 : vector<32x1xf32>
      %26 = math.rsqrt %25 : vector<32x1xf32>
      %27 = vector.broadcast %26 : vector<32x1xf32> to vector<32x128xf32>
      %28 = arith.mulf %23, %27 : vector<32x128xf32>
      %29 = vector.broadcast %9 : vector<1x128xf32> to vector<32x128xf32>
      %30 = arith.mulf %28, %29 : vector<32x128xf32>
      %31 = vector.broadcast %10 : vector<1x128xf32> to vector<32x128xf32>
      %32 = arith.addf %30, %31 : vector<32x128xf32>
      %33 = arith.truncf %32 : vector<32x128xf32> to vector<32x128xbf16>
      %c0_17 = arith.constant 0 : index
      %c0_18 = arith.constant 0 : index
      %34 = vector.load %arg7[%c0_17, %c0_18] : memref<32x128xbf16, #tpu.memory_space<vmem>>, vector<32x128xbf16>
      tpu.vector_store %arg7[%c0_17, %c0_18], %33 {strides = array<i32>} : memref<32x128xbf16, #tpu.memory_space<vmem>>, vector<32x128xbf16>,
    } else {
    }
    %c0 = arith.constant 0 : index
    %c0_1 = arith.constant 0 : index
    %3 = vector.load %arg7[%c0, %c0_1] : memref<32x128xbf16, #tpu.memory_space<vmem>>, vector<32x128xbf16>
    %c0_2 = arith.constant 0 : index
    %c0_3 = arith.constant 0 : index
    %4 = vector.load %arg5[%c0_2, %c0_3] : memref<128x384xbf16, #tpu.memory_space<vmem>>, vector<128x384xbf16>
    %cst = arith.constant dense<0.000000e+00> : vector<32x384xf32>
    %5 = tpu.matmul %3, %4, %cst {dimension_numbers = #tpu.dot_dimension_numbers<[1], [0], [0], [1], [0, 0, 1, 1], [], []>} : vector<32x128xbf16>, vector<128x384xbf16>, vector<32x384xf32> -> vector<32x384xf32>
    %6 = arith.truncf %5 : vector<32x384xf32> to vector<32x384xbf16>
    %c0_4 = arith.constant 0 : index
    %c0_5 = arith.constant 0 : index
    %7 = vector.load %arg6[%c0_4, %c0_5] : memref<32x384xbf16, #tpu.memory_space<vmem>>, vector<32x384xbf16>
    tpu.vector_store %arg6[%c0_4, %c0_5], %6 {strides = array<i32>} : memref<32x384xbf16, #tpu.memory_space<vmem>>, vector<32x384xbf16>,
    return
  }
  func.func @transform_0(%arg0: i32, %arg1: i32) -> (i32, i32) {
    %c0_i32 = arith.constant 0 : i32
    %c0_i32_0 = arith.constant 0 : i32
    return %arg0, %c0_i32 : i32, i32
  }
  func.func @transform_1(%arg0: i32, %arg1: i32) -> (i32, i32) {
    %c0_i32 = arith.constant 0 : i32
    %c0_i32_0 = arith.constant 0 : i32
    %c0_i32_1 = arith.constant 0 : i32
    return %c0_i32, %c0_i32_0 : i32, i32
  }
  func.func @transform_2(%arg0: i32, %arg1: i32) -> (i32, i32) {
    %c0_i32 = arith.constant 0 : i32
    %c0_i32_0 = arith.constant 0 : i32
    %c0_i32_1 = arith.constant 0 : i32
    return %c0_i32, %c0_i32_0 : i32, i32
  }
  func.func @transform_3(%arg0: i32, %arg1: i32) -> (i32, i32) {
    %c0_i32 = arith.constant 0 : i32
    %c0_i32_0 = arith.constant 0 : i32
    return %c0_i32, %arg1 : i32, i32
  }
  func.func @transform_4(%arg0: i32, %arg1: i32) -> (i32, i32) {
    %c0_i32 = arith.constant 0 : i32
    return %arg0, %arg1 : i32, i32
  }
}

module attributes {stable_mosaic.version = 11 : i64} {
  func.func @_ln_matmul_kernel(%arg0: i32, %arg1: i32, %arg2: memref<32x128xf32, #tpu.memory_space<vmem>>, %arg3: memref<1x128xf32, #tpu.memory_space<vmem>>, %arg4: memref<1x128xf32, #tpu.memory_space<vmem>>, %arg5: memref<128x384xbf16, #tpu.memory_space<vmem>>, %arg6: memref<32x384xbf16, #tpu.memory_space<vmem>>, %arg7: memref<32x128xbf16, #tpu.memory_space<vmem>>) attributes {dimension_semantics = [#tpu.dimension_semantics<parallel>, #tpu.dimension_semantics<arbitrary>], iteration_bounds = array<i64: 1, 1>, scalar_prefetch = 0 : i64, scratch_operands = 1 : i64, tpu.core_type = #tpu.core_type<tc>, window_params = [{transform_indices = @transform_0, window_bounds = array<i64: 32, 128>}, {pipeline_mode = #tpu.pipeline_mode<synchronous>, transform_indices = @transform_1, window_bounds = array<i64: 1, 128>}, {pipeline_mode = #tpu.pipeline_mode<synchronous>, transform_indices = @transform_2, window_bounds = array<i64: 1, 128>}, {transform_indices = @transform_3, window_bounds = array<i64: 128, 384>}, {transform_indices = @transform_4, window_bounds = array<i64: 32, 384>}]} {
    %c0_i32 = arith.constant 0 : i32
    %0 = arith.cmpi eq, %arg1, %c0_i32 : i32
    %1 = arith.extui %0 : i1 to i32
    %c0_i32_0 = arith.constant 0 : i32
    %2 = arith.cmpi ne, %1, %c0_i32_0 : i32
    scf.if %2 {
      %c0_6 = arith.constant 0 : index
      %c0_7 = arith.constant 0 : index
      %8 = vector.load %arg2[%c0_6, %c0_7] : memref<32x128xf32, #tpu.memory_space<vmem>>, vector<32x128xf32>
      %c0_8 = arith.constant 0 : index
      %c0_9 = arith.constant 0 : index
      %9 = vector.load %arg3[%c0_8, %c0_9] : memref<1x128xf32, #tpu.memory_space<vmem>>, vector<1x128xf32>
      %c0_10 = arith.constant 0 : index
      %c0_11 = arith.constant 0 : index
      %10 = vector.load %arg4[%c0_10, %c0_11] : memref<1x128xf32, #tpu.memory_space<vmem>>, vector<1x128xf32>
      %cst_12 = arith.constant dense<0.000000e+00> : vector<32xf32>
      %11 = vector.multi_reduction <add>, %8, %cst_12 [1] : vector<32x128xf32> to vector<32xf32>
      %12 = vector.shape_cast %11 : vector<32xf32> to vector<32x1xf32>
      %cst_13 = arith.constant 1.280000e+02 : f32
      %13 = vector.broadcast %cst_13 : f32 to vector<32x1xf32>
      %14 = arith.divf %12, %13 : vector<32x1xf32>
      %15 = vector.broadcast %14 : vector<32x1xf32> to vector<32x128xf32>
      %16 = arith.subf %8, %15 : vector<32x128xf32>
      %17 = arith.mulf %16, %16 : vector<32x128xf32>
      %cst_14 = arith.constant dense<0.000000e+00> : vector<32xf32>
      %18 = vector.multi_reduction <add>, %17, %cst_14 [1] : vector<32x128xf32> to vector<32xf32>
      %19 = vector.shape_cast %18 : vector<32xf32> to vector<32x1xf32>
      %cst_15 = arith.constant 1.280000e+02 : f32
      %20 = vector.broadcast %cst_15 : f32 to vector<32x1xf32>
      %21 = arith.divf %19, %20 : vector<32x1xf32>
      %22 = vector.broadcast %14 : vector<32x1xf32> to vector<32x128xf32>
      %23 = arith.subf %8, %22 : vector<32x128xf32>
      %cst_16 = arith.constant 9.99999974E-6 : f32
      %24 = vector.broadcast %cst_16 : f32 to vector<32x1xf32>
      %25 = arith.addf %21, %24 : vector<32x1xf32>
      %26 = math.rsqrt %25 : vector<32x1xf32>
      %27 = vector.broadcast %26 : vector<32x1xf32> to vector<32x128xf32>
      %28 = arith.mulf %23, %27 : vector<32x128xf32>
      %29 = vector.broadcast %9 : vector<1x128xf32> to vector<32x128xf32>
      %30 = arith.mulf %28, %29 : vector<32x128xf32>
      %31 = vector.broadcast %10 : vector<1x128xf32> to vector<32x128xf32>
      %32 = arith.addf %30, %31 : vector<32x128xf32>
      %33 = arith.truncf %32 : vector<32x128xf32> to vector<32x128xbf16>
      %c0_17 = arith.constant 0 : index
      %c0_18 = arith.constant 0 : index
      %34 = vector.load %arg7[%c0_17, %c0_18] : memref<32x128xbf16, #tpu.memory_space<vmem>>, vector<32x128xbf16>
      tpu.vector_store %arg7[%c0_17, %c0_18], %33 {strides = array<i32>} : memref<32x128xbf16, #tpu.memory_space<vmem>>, vector<32x128xbf16>,
    } else {
    }
    %c0 = arith.constant 0 : index
    %c0_1 = arith.constant 0 : index
    %3 = vector.load %arg7[%c0, %c0_1] : memref<32x128xbf16, #tpu.memory_space<vmem>>, vector<32x128xbf16>
    %c0_2 = arith.constant 0 : index
    %c0_3 = arith.constant 0 : index
    %4 = vector.load %arg5[%c0_2, %c0_3] : memref<128x384xbf16, #tpu.memory_space<vmem>>, vector<128x384xbf16>
    %cst = arith.constant dense<0.000000e+00> : vector<32x384xf32>
    %5 = tpu.matmul %3, %4, %cst {dimension_numbers = #tpu.dot_dimension_numbers<[1], [0], [0], [1], [0, 0, 1, 1], [], []>} : vector<32x128xbf16>, vector<128x384xbf16>, vector<32x384xf32> -> vector<32x384xf32>
    %6 = arith.truncf %5 : vector<32x384xf32> to vector<32x384xbf16>
    %c0_4 = arith.constant 0 : index
    %c0_5 = arith.constant 0 : index
    %7 = vector.load %arg6[%c0_4, %c0_5] : memref<32x384xbf16, #tpu.memory_space<vmem>>, vector<32x384xbf16>
    tpu.vector_store %arg6[%c0_4, %c0_5], %6 {strides = array<i32>} : memref<32x384xbf16, #tpu.memory_space<vmem>>, vector<32x384xbf16>,
    return
  }
  func.func @transform_0(%arg0: i32, %arg1: i32) -> (i32, i32) {
    %c0_i32 = arith.constant 0 : i32
    %c0_i32_0 = arith.constant 0 : i32
    return %arg0, %c0_i32 : i32, i32
  }
  func.func @transform_1(%arg0: i32, %arg1: i32) -> (i32, i32) {
    %c0_i32 = arith.constant 0 : i32
    %c0_i32_0 = arith.constant 0 : i32
    %c0_i32_1 = arith.constant 0 : i32
    return %c0_i32, %c0_i32_0 : i32, i32
  }
  func.func @transform_2(%arg0: i32, %arg1: i32) -> (i32, i32) {
    %c0_i32 = arith.constant 0 : i32
    %c0_i32_0 = arith.constant 0 : i32
    %c0_i32_1 = arith.constant 0 : i32
    return %c0_i32, %c0_i32_0 : i32, i32
  }
  func.func @transform_3(%arg0: i32, %arg1: i32) -> (i32, i32) {
    %c0_i32 = arith.constant 0 : i32
    %c0_i32_0 = arith.constant 0 : i32
    return %c0_i32, %arg1 : i32, i32
  }
  func.func @transform_4(%arg0: i32, %arg1: i32) -> (i32, i32) {
    %c0_i32 = arith.constant 0 : i32
    return %arg0, %arg1 : i32, i32
  }
}

module attributes {stable_mosaic.version = 11 : i64} {
  func.func @_ln_kernel(%arg0: i32, %arg1: memref<32x128xf32, #tpu.memory_space<vmem>>, %arg2: memref<1x128xf32, #tpu.memory_space<vmem>>, %arg3: memref<1x128xf32, #tpu.memory_space<vmem>>, %arg4: memref<32x128xf32, #tpu.memory_space<vmem>>) attributes {dimension_semantics = [#tpu.dimension_semantics<parallel>], iteration_bounds = array<i64: 1>, scalar_prefetch = 0 : i64, scratch_operands = 0 : i64, tpu.core_type = #tpu.core_type<tc>, window_params = [{transform_indices = @transform_0, window_bounds = array<i64: 32, 128>}, {pipeline_mode = #tpu.pipeline_mode<synchronous>, transform_indices = @transform_1, window_bounds = array<i64: 1, 128>}, {pipeline_mode = #tpu.pipeline_mode<synchronous>, transform_indices = @transform_2, window_bounds = array<i64: 1, 128>}, {transform_indices = @transform_3, window_bounds = array<i64: 32, 128>}]} {
    %c0 = arith.constant 0 : index
    %c0_0 = arith.constant 0 : index
    %0 = vector.load %arg1[%c0, %c0_0] : memref<32x128xf32, #tpu.memory_space<vmem>>, vector<32x128xf32>
    %c0_1 = arith.constant 0 : index
    %c0_2 = arith.constant 0 : index
    %1 = vector.load %arg2[%c0_1, %c0_2] : memref<1x128xf32, #tpu.memory_space<vmem>>, vector<1x128xf32>
    %c0_3 = arith.constant 0 : index
    %c0_4 = arith.constant 0 : index
    %2 = vector.load %arg3[%c0_3, %c0_4] : memref<1x128xf32, #tpu.memory_space<vmem>>, vector<1x128xf32>
    %cst = arith.constant dense<0.000000e+00> : vector<32xf32>
    %3 = vector.multi_reduction <add>, %0, %cst [1] : vector<32x128xf32> to vector<32xf32>
    %4 = vector.shape_cast %3 : vector<32xf32> to vector<32x1xf32>
    %cst_5 = arith.constant 1.280000e+02 : f32
    %5 = vector.broadcast %cst_5 : f32 to vector<32x1xf32>
    %6 = arith.divf %4, %5 : vector<32x1xf32>
    %7 = vector.broadcast %6 : vector<32x1xf32> to vector<32x128xf32>
    %8 = arith.subf %0, %7 : vector<32x128xf32>
    %9 = arith.mulf %8, %8 : vector<32x128xf32>
    %cst_6 = arith.constant dense<0.000000e+00> : vector<32xf32>
    %10 = vector.multi_reduction <add>, %9, %cst_6 [1] : vector<32x128xf32> to vector<32xf32>
    %11 = vector.shape_cast %10 : vector<32xf32> to vector<32x1xf32>
    %cst_7 = arith.constant 1.280000e+02 : f32
    %12 = vector.broadcast %cst_7 : f32 to vector<32x1xf32>
    %13 = arith.divf %11, %12 : vector<32x1xf32>
    %14 = vector.broadcast %6 : vector<32x1xf32> to vector<32x128xf32>
    %15 = arith.subf %0, %14 : vector<32x128xf32>
    %cst_8 = arith.constant 9.99999974E-6 : f32
    %16 = vector.broadcast %cst_8 : f32 to vector<32x1xf32>
    %17 = arith.addf %13, %16 : vector<32x1xf32>
    %18 = math.rsqrt %17 : vector<32x1xf32>
    %19 = vector.broadcast %18 : vector<32x1xf32> to vector<32x128xf32>
    %20 = arith.mulf %15, %19 : vector<32x128xf32>
    %21 = vector.broadcast %1 : vector<1x128xf32> to vector<32x128xf32>
    %22 = arith.mulf %20, %21 : vector<32x128xf32>
    %23 = vector.broadcast %2 : vector<1x128xf32> to vector<32x128xf32>
    %24 = arith.addf %22, %23 : vector<32x128xf32>
    %c0_9 = arith.constant 0 : index
    %c0_10 = arith.constant 0 : index
    %25 = vector.load %arg4[%c0_9, %c0_10] : memref<32x128xf32, #tpu.memory_space<vmem>>, vector<32x128xf32>
    tpu.vector_store %arg4[%c0_9, %c0_10], %24 {strides = array<i32>} : memref<32x128xf32, #tpu.memory_space<vmem>>, vector<32x128xf32>,
    return
  }
  func.func @transform_0(%arg0: i32) -> (i32, i32) {
    %c0_i32 = arith.constant 0 : i32
    %c0_i32_0 = arith.constant 0 : i32
    return %arg0, %c0_i32 : i32, i32
  }
  func.func @transform_1(%arg0: i32) -> (i32, i32) {
    %c0_i32 = arith.constant 0 : i32
    %c0_i32_0 = arith.constant 0 : i32
    %c0_i32_1 = arith.constant 0 : i32
    return %c0_i32, %c0_i32_0 : i32, i32
  }
  func.func @transform_2(%arg0: i32) -> (i32, i32) {
    %c0_i32 = arith.constant 0 : i32
    %c0_i32_0 = arith.constant 0 : i32
    %c0_i32_1 = arith.constant 0 : i32
    return %c0_i32, %c0_i32_0 : i32, i32
  }
  func.func @transform_3(%arg0: i32) -> (i32, i32) {
    %c0_i32 = arith.constant 0 : i32
    %c0_i32_0 = arith.constant 0 : i32
    return %arg0, %c0_i32 : i32, i32
  }
}

</mosaic_0001>

<bundles_post_ra>
// kernel: transformer_forward.10
= control target key start
LH: loop header
LB: loop body
LE: loop exit
PB: predicated region body
PF: predicated region fallthrough
CT: control target
= control target key end

     0   :  { %s569_s6 = smov 0   ;;  %s619_s0 = inlined_call_operand.vmem [shape: bf16[2,16,384], index: 0, kind: input, shape index: {}]   ;;  %s620_s1 = inlined_call_operand.vmem [shape: bf16[2,16,128], index: 1, kind: output, shape index: {}]  }
   0x1 LB: > { %s452_s7 = sadd.s32 4294967295, %s554_s6   ;;  %p456_p0 = scmp.ge.s32.totalorder %s554_s6, 1  ;;  %s554_s6 = sphi %s569_s6, %s11_s6  }
   0x2   : > { %p87_p1 = scmp.lt.s32.totalorder %s554_s6, 3 }
   0x4   : > { %p88_p2 = pnand %p456_p0, %p87_p1 }
   0x5   : > { %p107_p3 = scmp.lt.s32.totalorder (!%p88_p2), %s452_s7, 1  ;;  %v556_v0 = vmov (!%p88_p2), 0.0   ;;  %vm557_vm0 = vmmov (!%p88_p2), 0   ;;  %vm130_vm1 = vcmask (!%p88_p2), 523264   ;;  %vm180_vm2 = vcmask (!%p88_p2), 130048   ;;  %s558_s12 = smov (!%p88_p2), 64  }
   0x6   : > { %91 = sbr.rel (%p88_p2) target bundleno = 1437 (0x59d), region = 24  ;;  %487 = vmatprep.subr.bf16.mxu0 (!%p88_p2), %v556_v0  ;;  %489 = vmatprep.mubr.msk.bf16.mxu0 (!%p88_p2), %vm557_vm0, %v556_v0 }
   0x7   : > { %493 = vmatprep.subr.bf16.mxu1 (!%p88_p2), %v556_v0  ;;  %495 = vmatprep.mubr.msk.bf16.mxu1 (!%p88_p2), %vm557_vm0, %v556_v0 }
   0xd   : > { %s622_s7 = smov (!%p107_p3, %s452_s7), 1 }
   0xe   : > { %s511_s8 = smul.u32 24, %s622_s7  ;;  %s471_s13 = sshll.u32 %s622_s7, 3 }
   0xf   : > { %s116_s16 = scalar_lea.vmem %s620_s1, %s471_s13 }
  0x10   : > { %s585_s11 = scalar_lea.vmem %s619_s0, %s511_s8 }
  0x11   : > { %v530_v1 = vld [vmem:[%s585_s11 + $0x4] ss:$12 sps:$4 sm:$0xff]   ;;  %v528_v3 = vld [vmem:[%s585_s11] ss:$12 sps:$4 sm:$0xff]   ;;  %v531_v22 = vld [vmem:[%s585_s11 + $0x8] ss:$12 sps:$4 sm:$0xff]  }
  0x12   : > { %v135_v2 = vsel %vm130_vm1, %v530_v1, 0  ;;  %494 = vmatpush3.bf16.msra.mxu1 %v531_v22 }
  0x13   : > { %488 = vmatpush3.bf16.xpose.msra.mxu0 %v135_v2  ;;  %499 = vmatprep.subr.bf16.mxu1 %v556_v0 }
  0x14   : > { %505 = vmatprep.subr.bf16.mxu0 %v556_v0 }
  0x1a   : > { %490 = vmatmul.mubr.msk.bf16.vlgmr.msra.gmra.mrb[0].mxu0 %vm130_vm1, %v528_v3 }
  0x1b   : > { %507 = vmatprep.mubr.msk.bf16.mxu0 %vm557_vm0, %v556_v0 }
  0xed   : > { %v171_v4 = vpop.f32.mrb[0].mxu0 }
  0xee   : > { %v178_v5 = vmul.f32 0.125, %v171_v4  ;;  %v491_v6 = vpop.f32.mrb[1].mxu0 }
  0xef   : > { %v174_v7 = vpop.f32.mrb[2].mxu0 }
  0xf0   : > { %v179_v8 = vmul.f32 0.125, %v174_v7  ;;  %v492_v9 = vpop.f32.mrb[3].mxu0  ;;  %v181_v10 = vsel %vm180_vm2, %v178_v5, -inf }
  0xf1   : > { %182 = vmax.xlane.f32.xlu0 %v181_v10 }
  0xf2   : > { %v184_v11 = vsel %vm180_vm2, %v179_v8, -inf }
  0xf5   : > { %185 = vmax.xlane.f32.xlu0 %v184_v11 }
 0x10b   : > { %256 = vrot.lane.b32.xlu0 %v530_v1, %s558_s12 }
 0x17e   : > { %v183_v12 = vpop.xlane.xlu0 %182 }
 0x17f   : > { %v187_v13 = vsub.f32 %v178_v5, %v183_v12 }
 0x181   : > { %v189_v14 = vmul.f32 1.442695, %v187_v13 }
 0x182   : > { %v186_v15 = vpop.xlane.xlu0 %185 }
 0x183   : > { %532 = vpow2.f32 %v189_v14  ;;  %v188_v16 = vsub.f32 %v179_v8, %v186_v15 }
 0x185   : > { %v191_v17 = vmul.f32 1.442695, %v188_v16 }
 0x186   : > { %v257_v27 = vpop.permute.xlu0 %256 }
 0x187   : > { %534 = vpow2.f32 %v191_v17  ;;  %v262_v30 = vsel %vm130_vm1, %v257_v27, 0 }
 0x18d   : > { %v533_v18 = vpop.eup %532 }
 0x18e   : > { %v193_v19 = vsel %vm180_vm2, %v533_v18, 0.0 }
 0x18f   : > { %194 = vadd.xlane.f32.xlu1 %v193_v19 }
 0x191   : > { %v535_v20 = vpop.eup %534 }
 0x192   : > { %v196_v21 = vsel %vm180_vm2, %v535_v20, 0.0 }
 0x193   : > { %197 = vadd.xlane.f32.xlu1 %v196_v21 }
 0x1a4   : > { %254 = vrot.lane.b32.xlu1 %v528_v3, %s558_s12 }
 0x21c   : > { %v195_v23 = vpop.xlane.xlu1 %194 }
 0x21d   : > { %536 = vrcp.f32 %v195_v23 }
 0x220   : > { %v198_v24 = vpop.xlane.xlu1 %197 }
 0x221   : > { %538 = vrcp.f32 %v198_v24 }
 0x224   : > { %v255_v32 = vpop.permute.xlu1 %254 }
 0x227   : > { %v537_v25 = vpop.eup %536 }
 0x228   : > { %v201_v28 = vmul.f32 %v537_v25, %v533_v18 }
 0x22b   : > { %v539_v26 = vpop.eup %538 }
 0x22c   : > { %v202_v29 = vmul.f32 %v539_v26, %v535_v20 }
 0x22e   : > { %v203_v31 = vpack.c.bf16 %v202_v29, %v201_v28 }
 0x230   : > { %496 = vmatmul.mubr.msk.bf16.vlgmr.msra.gmra.mrb[0].mxu1 %vm180_vm2, %v203_v31 }
 0x231   : > { %500 = vmatpush3.bf16.xpose.msra.mxu1 %v262_v30  ;;  %501 = vmatprep.mubr.msk.bf16.mxu1 %vm557_vm0, %v556_v0 }
 0x238   : > { %502 = vmatmul.mubr.msk.bf16.vlgmr.msra.gmra.mrb[4].mxu1 %vm130_vm1, %v255_v32 }
 0x303   : > { %v247_v33 = vpop.f32.mrb[0].mxu1 }
 0x304   : > { %v497_v34 = vpop.f32.mrb[1].mxu1 }
 0x305   : > { %v250_v35 = vpop.f32.mrb[2].mxu1 }
 0x306   : > { %v498_v36 = vpop.f32.mrb[3].mxu1 }
 0x30b   : > { %v298_v37 = vpop.f32.mrb[4].mxu1 }
 0x30c   : > { %v305_v38 = vmul.f32 0.125, %v298_v37  ;;  %v503_v39 = vpop.f32.mrb[5].mxu1 }
 0x30d   : > { %v301_v40 = vpop.f32.mrb[6].mxu1 }
 0x30e   : > { %v306_v41 = vmul.f32 0.125, %v301_v40  ;;  %v504_v42 = vpop.f32.mrb[7].mxu1  ;;  %v307_v43 = vsel %vm180_vm2, %v305_v38, -inf }
 0x30f   : > { %308 = vmax.xlane.f32.xlu1 %v307_v43 }
 0x310   : > { %v310_v44 = vsel %vm180_vm2, %v306_v41, -inf }
 0x311   : > { %311 = vmax.xlane.f32.xlu0 %v310_v44 }
 0x39c   : > { %v309_v45 = vpop.xlane.xlu1 %308 }
 0x39d   : > { %v313_v46 = vsub.f32 %v305_v38, %v309_v45 }
 0x39e   : > { %v312_v47 = vpop.xlane.xlu0 %311 }
 0x39f   : > { %v315_v48 = vmul.f32 1.442695, %v313_v46  ;;  %v314_v49 = vsub.f32 %v306_v41, %v312_v47 }
 0x3a1   : > { %540 = vpow2.f32 %v315_v48  ;;  %v317_v50 = vmul.f32 1.442695, %v314_v49 }
 0x3a3   : > { %542 = vpow2.f32 %v317_v50 }
 0x3ab   : > { %v541_v51 = vpop.eup %540 }
 0x3ac   : > { %v319_v52 = vsel %vm180_vm2, %v541_v51, 0.0 }
 0x3ad   : > { %v543_v53 = vpop.eup %542  ;;  %320 = vadd.xlane.f32.xlu0 %v319_v52 }
 0x3ae   : > { %v322_v54 = vsel %vm180_vm2, %v543_v53, 0.0 }
 0x3af   : > { %323 = vadd.xlane.f32.xlu1 %v322_v54 }
 0x3c3   : > { %330 = vrot.lane.b32.xlu0 %v531_v22, %s558_s12 }
 0x43a   : > { %v321_v55 = vpop.xlane.xlu0 %320 }
 0x43b   : > { %544 = vrcp.f32 %v321_v55 }
 0x43c   : > { %v324_v56 = vpop.xlane.xlu1 %323 }
 0x43d   : > { %546 = vrcp.f32 %v324_v56 }
 0x43e   : > { %v331_v57 = vpop.permute.xlu0 %330 }
 0x43f   : > { %506 = vmatpush3.bf16.msra.mxu0 %v331_v57 }
 0x445   : > { %v545_v58 = vpop.eup %544 }
 0x446   : > { %v327_v60 = vmul.f32 %v545_v58, %v541_v51 }
 0x447   : > { %v547_v59 = vpop.eup %546 }
 0x448   : > { %v328_v61 = vmul.f32 %v547_v59, %v543_v53 }
 0x44a   : > { %v329_v62 = vpack.c.bf16 %v328_v61, %v327_v60 }
 0x44c   : > { %508 = vmatmul.mubr.msk.bf16.vlgmr.msra.gmra.mrb[4].mxu0 %vm180_vm2, %v329_v62 }
 0x51f   : > { %v370_v63 = vpop.f32.mrb[4].mxu0 }
 0x520   : > { %v509_v0 = vpop.f32.mrb[5].mxu0 }
 0x521   : > { %v373_v1 = vpop.f32.mrb[6].mxu0 }
 0x522   : > { %v523_v2 = vpack.i.bf16 %v373_v1, %v370_v63  ;;  %v510_v3 = vpop.f32.mrb[7].mxu0 }
 0x524   : > { %524 = vrot.lane.b32.xlu1 %v523_v2, %s558_s12 }
 0x596   : > { %v525_v4 = vpop.permute.xlu1 %524 }
 0x597   : > { %v527_v5 = vunpack.i.h.bf16 %v525_v4  ;;  %v526_v6 = vunpack.i.l.bf16 %v525_v4 }
 0x599   : > { %v386_v7 = vsel %vm130_vm1, %v250_v35, %v527_v5  ;;  %v385_v8 = vsel %vm130_vm1, %v247_v33, %v526_v6 }
 0x59a   : > { %v477_v9 = vpack.c.bf16 %v386_v7, %v385_v8 }
 0x59c   : > { %478 = vst [vmem:[%s116_s16] sm:$0xff] %v477_v9  }
 0x59d PF: > { %s11_s6 = sadd.s32 1, %s554_s6  }
 0x59e   : > { %p8_p4 = scmp.ge.s32.totalorder %s11_s6, 4  }
 0x5a0   :  { %10 = sbr.rel (!%p8_p4) target bundleno = 1 (0x1), region = 54 }

// kernel: transformer_forward.11
= control target key start
LH: loop header
LB: loop body
LE: loop exit
PB: predicated region body
PF: predicated region fallthrough
CT: control target
= control target key end

     0   :  { %s280_s1 = inlined_call_operand.vmem [shape: bf16[128,128], index: 1, kind: input, shape index: {}]   ;;  %s281_s0 = inlined_call_operand.vmem [shape: bf16[32,128], index: 0, kind: input, shape index: {}]   ;;  %s282_s2 = inlined_call_operand.vmem [shape: f32[32,128], index: 2, kind: input, shape index: {}]   ;;  %s283_s3 = inlined_call_operand.vmem [shape: f32[32,128], index: 3, kind: output, shape index: {}]  }
   0x1   :  { %v196_v0 = vld [vmem:[%s280_s1] sm:$0xff]   ;;  %v197_v1 = vld [vmem:[%s280_s1 + $0x8] sm:$0xff]   ;;  %v198_v2 = vld [vmem:[%s280_s1 + $0x10] sm:$0xff]  }
   0x2   :  { %176 = vmatprep.subr.bf16.mxu0 %v196_v0  ;;  %v199_v3 = vld [vmem:[%s280_s1 + $0x18] sm:$0xff]   ;;  %v204_v4 = vld [vmem:[%s281_s0] sm:$0xff]   ;;  %v201_v6 = vld [vmem:[%s280_s1 + $0x28] sm:$0xff]  }
   0x3   :  { %177 = vmatpush3.bf16.msra.mxu0 %v196_v0  ;;  %192 = vmatprep.mubr.bf16.mxu0 %v204_v4  ;;  %v200_v5 = vld [vmem:[%s280_s1 + $0x20] sm:$0xff]   ;;  %v202_v7 = vld [vmem:[%s280_s1 + $0x30] sm:$0xff]   ;;  %v203_v8 = vld [vmem:[%s280_s1 + $0x38] sm:$0xff]  }
   0x4   :  { %178 = vmatprep.subr.bf16.mxu0 %v197_v1  ;;  %v205_v9 = vld [vmem:[%s281_s0 + $0x8] sm:$0xff]   ;;  %v37_v10 = vld [vmem:[%s282_s2 + $0x10] sm:$0xff]  ;;  %v35_v11 = vld [vmem:[%s282_s2] sm:$0xff] }
   0x5   :  { %v38_v13 = vld [vmem:[%s282_s2 + $0x18] sm:$0xff]  ;;  %v36_v16 = vld [vmem:[%s282_s2 + $0x8] sm:$0xff] }
   0x7   :  { %179 = vmatpush3.bf16.msra.mxu0 %v197_v1 }
   0x8   :  { %180 = vmatprep.subr.bf16.mxu0 %v198_v2 }
   0xb   :  { %181 = vmatpush3.bf16.msra.mxu0 %v198_v2 }
   0xc   :  { %182 = vmatprep.subr.bf16.mxu0 %v199_v3 }
   0xf   :  { %183 = vmatpush3.bf16.msra.mxu0 %v199_v3 }
  0x10   :  { %184 = vmatprep.subr.bf16.mxu0 %v200_v5 }
  0x13   :  { %185 = vmatpush3.bf16.msra.mxu0 %v200_v5 }
  0x14   :  { %186 = vmatprep.subr.bf16.mxu0 %v201_v6 }
  0x17   :  { %187 = vmatpush3.bf16.msra.mxu0 %v201_v6 }
  0x18   :  { %188 = vmatprep.subr.bf16.mxu0 %v202_v7 }
  0x1b   :  { %189 = vmatpush3.bf16.msra.mxu0 %v202_v7 }
  0x1c   :  { %190 = vmatprep.subr.bf16.mxu0 %v203_v8 }
  0x1f   :  { %191 = vmatpush3.bf16.msra.mxu0 %v203_v8 }
  0x22   :  { %193 = vmatmul.mubr.bf16.vlgmr.msra.gmra.mrb[0].mxu0 %v205_v9 }
  0xf5   :  { %v194_v12 = vpop.f32.mrb[0].mxu0 }
  0xf6   :  { %v142_v14 = vadd.f32 %v194_v12, %v37_v10  ;;  %v133_v15 = vpop.f32.mrb[1].mxu0 }
  0xf7   :  { %v134_v17 = vadd.f32 %v133_v15, %v35_v11  ;;  %v195_v18 = vpop.f32.mrb[2].mxu0 }
  0xf8   :  { %150 = vst [vmem:[%s283_s3 + $0x10] sm:$0xff] %v142_v14  ;;  %v145_v19 = vadd.f32 %v195_v18, %v38_v13  ;;  %v136_v20 = vpop.f32.mrb[3].mxu0 }
  0xf9   :  { %148 = vst [vmem:[%s283_s3] sm:$0xff] %v134_v17  ;;  %v137_v21 = vadd.f32 %v136_v20, %v36_v16 }
  0xfa   :  { %151 = vst [vmem:[%s283_s3 + $0x18] sm:$0xff] %v145_v19 }
  0xfb   :  { %149 = vst [vmem:[%s283_s3 + $0x8] sm:$0xff] %v137_v21 }

// kernel: transformer_forward.9
= control target key start
LH: loop header
LB: loop body
LE: loop exit
PB: predicated region body
PF: predicated region fallthrough
CT: control target
= control target key end

     0   :  { %9 = vsyncpa [#allocation4], 0  ;;  %s568_s15 = smov [#allocation3]   ;;  %s671_s0 = inlined_call_operand.vmem [shape: f32[32,128], index: 0, kind: input, shape index: {}]   ;;  %s672_s1 = inlined_call_operand.vmem [shape: f32[1,128], index: 1, kind: input, shape index: {}]   ;;  %s673_s2 = inlined_call_operand.vmem [shape: f32[1,128], index: 2, kind: input, shape index: {}]   ;;  %s674_s3 = inlined_call_operand.hbm [shape: bf16[128,384], index: 3, kind: input, shape index: {}]   ;;  %s675_s4 = inlined_call_operand.vmem [shape: bf16[32,384], index: 4, kind: output, shape index: {}]  }
   0x1   :  { %s21_s16 = sshll.u32 %s568_s15, 4  ;;  %s544_s19 = scalar_lea.hbm %s674_s3, 3072  ;;  %s22_s16 = int_to_ptr.vmem [resolvable:$true] %s21_s16 }
   0x2   :  { %p545_p0 = scmp.ne.s32.totalorder %s674_s3, %s544_s19  ;;  %p548_p1 = scmp.lt.u32.totalorder %s544_s19, %s674_s3 }
   0x4   :  { %p550_p2 = pnand %p548_p1, %p545_p0 }
   0x6   :  { %553 = shalt.err (!%p550_p2)
}
   0x7   :  { %s554_s24 = scalar_lea.vmem %s22_s16, 3072  ;;  %p559_p4 = scmp.lt.s32.totalorder %s22_s16, %s22_s16 }
   0x8   :  { %p555_p3 = scmp.ne.s32.totalorder %s22_s16, %s554_s24  ;;  %p560_p5 = scmp.lt.s32.totalorder %s554_s24, %s554_s24 }
   0xa   :  { %p561_p6 = por %p560_p5, %p559_p4 }
   0xc   :  { %p562_p7 = pnand %p561_p6, %p555_p3 }
   0xe   :  { %565 = shalt.err (!%p562_p7)
}
   0xf   :  { %s569_s25 = smov 192   ;;  %s570_s26 = smov 12  }
  0x10   :  { %27 = dma.hbm_to_vmem [thread:$0]  %s674_s3, 3072, %s22_s16, [#allocation4], %s569_s25, %s569_s25, %s570_s26  }
  0x11   :  { %566 = dma.done.wait [#allocation4], 3072  }
  0x12   :  { %567 = vsyncadd [#allocation4], 4294964224  ;;  %v36_v0 = vld [vmem:[%s671_s0] sm:$0xff]  ;;  %v38_v1 = vld [vmem:[%s671_s0 + $0x10] sm:$0xff]  ;;  %v571_v39 = vmov 0  }
  0x13   :  { %v37_v2 = vld [vmem:[%s671_s0 + $0x8] sm:$0xff]  ;;  %42 = vadd.xlane.f32.xlu0 %v36_v0  ;;  %46 = vadd.xlane.f32.xlu1 %v38_v1  ;;  %v39_v3 = vld [vmem:[%s671_s0 + $0x18] sm:$0xff]  ;;  %v504_v4 = vld [vmem:[#allocation3 + $0x4] ss:$12 sps:$4 sm:$0xff]  }
  0x14   :  { %v506_v5 = vld [vmem:[#allocation3] ss:$12 sps:$4 sm:$0xff]   ;;  %v507_v6 = vld [vmem:[#allocation3 + $0x1c] ss:$12 sps:$4 sm:$0xff]   ;;  %273 = vmatprep.subr.bf16.mxu0 %v504_v4  ;;  %v510_v24 = vld [vmem:[#allocation3 + $0x18] ss:$12 sps:$4 sm:$0xff]   ;;  %305 = vmatprep.mubr.bf16.mxu0 %v571_v39 }
  0x15   :  { %v509_v7 = vld [vmem:[#allocation3 + $0x8] ss:$12 sps:$4 sm:$0xff]   ;;  %274 = vmatpush1.bf16.msra.mxu0 %v506_v5  ;;  %v513_v26 = vld [vmem:[#allocation3 + $0x20] ss:$12 sps:$4 sm:$0xff]   ;;  %v514_v27 = vld [vmem:[#allocation3 + $0x30] ss:$12 sps:$4 sm:$0xff]  }
  0x16   :  { %480 = vmatprep.subr.bf16.mxu1 %v509_v7  ;;  %275 = vmatprep.subr.bf16.mxu0 %v507_v6  ;;  %v511_v25 = vld [vmem:[#allocation3 + $0x34] ss:$12 sps:$4 sm:$0xff]   ;;  %v515_v28 = vld [vmem:[#allocation3 + $0x4c] ss:$12 sps:$4 sm:$0xff]   ;;  %v519_v31 = vld [vmem:[#allocation3 + $0x64] ss:$12 sps:$4 sm:$0xff]  }
  0x17   :  { %44 = vadd.xlane.f32.xlu0 %v37_v2  ;;  %48 = vadd.xlane.f32.xlu1 %v39_v3  ;;  %v517_v29 = vld [vmem:[#allocation3 + $0x38] ss:$12 sps:$4 sm:$0xff]   ;;  %v518_v30 = vld [vmem:[#allocation3 + $0x48] ss:$12 sps:$4 sm:$0xff]   ;;  %v521_v32 = vld [vmem:[#allocation3 + $0x50] ss:$12 sps:$4 sm:$0xff]  }
  0x18   :  { %481 = vmatpush3.bf16.msra.mxu1 %v509_v7  ;;  %v522_v33 = vld [vmem:[#allocation3 + $0x60] ss:$12 sps:$4 sm:$0xff]   ;;  %v523_v34 = vld [vmem:[#allocation3 + $0x7c] ss:$12 sps:$4 sm:$0xff]   ;;  %v526_v36 = vld [vmem:[#allocation3 + $0x78] ss:$12 sps:$4 sm:$0xff]  }
  0x19   :  { %276 = vmatpush1.bf16.msra.mxu0 %v510_v24  ;;  %482 = vmatprep.subr.bf16.mxu1 %v513_v26  ;;  %v525_v35 = vld [vmem:[#allocation3 + $0x68] ss:$12 sps:$4 sm:$0xff]   ;;  %v529_v38 = vld [vmem:[#allocation3 + $0x80] ss:$12 sps:$4 sm:$0xff]   ;;  %v530_v40 = vld [vmem:[#allocation3 + $0x90] ss:$12 sps:$4 sm:$0xff]  }
  0x1a   :  { %277 = vmatprep.subr.bf16.mxu0 %v511_v25  ;;  %v527_v37 = vld [vmem:[#allocation3 + $0x94] ss:$12 sps:$4 sm:$0xff]   ;;  %v531_v41 = vld [vmem:[#allocation3 + $0xac] ss:$12 sps:$4 sm:$0xff]   ;;  %v535_v44 = vld [vmem:[#allocation3 + $0xb0] ss:$12 sps:$4 sm:$0xff]  }
  0x1b   :  { %v533_v42 = vld [vmem:[#allocation3 + $0x98] ss:$12 sps:$4 sm:$0xff]   ;;  %v534_v43 = vld [vmem:[#allocation3 + $0xa8] ss:$12 sps:$4 sm:$0xff]   ;;  %v428_v59 = vld [vmem:[%s672_s1] ss:$0 sm:$0xff] }
  0x1c   :  { %483 = vmatpush3.bf16.msra.mxu1 %v513_v26 }
  0x1d   :  { %278 = vmatpush1.bf16.msra.mxu0 %v514_v27  ;;  %484 = vmatprep.subr.bf16.mxu1 %v517_v29 }
  0x1e   :  { %279 = vmatprep.subr.bf16.mxu0 %v515_v28 }
  0x20   :  { %485 = vmatpush3.bf16.msra.mxu1 %v517_v29 }
  0x21   :  { %280 = vmatpush1.bf16.msra.mxu0 %v518_v30  ;;  %486 = vmatprep.subr.bf16.mxu1 %v521_v32 }
  0x22   :  { %281 = vmatprep.subr.bf16.mxu0 %v519_v31 }
  0x24   :  { %487 = vmatpush3.bf16.msra.mxu1 %v521_v32 }
  0x25   :  { %282 = vmatpush1.bf16.msra.mxu0 %v522_v33  ;;  %488 = vmatprep.subr.bf16.mxu1 %v525_v35 }
  0x26   :  { %283 = vmatprep.subr.bf16.mxu0 %v523_v34 }
  0x28   :  { %489 = vmatpush3.bf16.msra.mxu1 %v525_v35 }
  0x29   :  { %284 = vmatpush1.bf16.msra.mxu0 %v526_v36  ;;  %490 = vmatprep.subr.bf16.mxu1 %v529_v38 }
  0x2a   :  { %285 = vmatprep.subr.bf16.mxu0 %v527_v37 }
  0x2c   :  { %491 = vmatpush3.bf16.msra.mxu1 %v529_v38 }
  0x2d   :  { %286 = vmatpush1.bf16.msra.mxu0 %v530_v40  ;;  %492 = vmatprep.subr.bf16.mxu1 %v533_v42 }
  0x2e   :  { %287 = vmatprep.subr.bf16.mxu0 %v531_v41 }
  0x30   :  { %493 = vmatpush3.bf16.msra.mxu1 %v533_v42 }
  0x31   :  { %288 = vmatpush1.bf16.msra.mxu0 %v534_v43  ;;  %494 = vmatprep.subr.bf16.mxu1 %v535_v44 }
  0x34   :  { %495 = vmatpush3.bf16.msra.mxu1 %v535_v44 }
  0xa0   :  { %v43_v8 = vpop.xlane.xlu0 %42  ;;  %v47_v9 = vpop.xlane.xlu1 %46 }
  0xa1   :  { %v51_v10 = vmul.f32 0.0078125, %v43_v8  ;;  %v53_v11 = vmul.f32 0.0078125, %v47_v9 }
  0xa3   :  { %v621_v12 = vsub.f32 %v36_v0, %v51_v10  ;;  %v623_v13 = vsub.f32 %v38_v1, %v53_v11  ;;  %v429_v0 = vld [vmem:[%s673_s2] ss:$0 sm:$0xff] }
  0xa4   :  { %v45_v14 = vpop.xlane.xlu0 %44  ;;  %v49_v15 = vpop.xlane.xlu1 %48 }
  0xa5   :  { %v52_v16 = vmul.f32 0.0078125, %v45_v14  ;;  %v59_v17 = vmul.f32 %v621_v12, %v621_v12  ;;  %v54_v18 = vmul.f32 0.0078125, %v49_v15  ;;  %v61_v21 = vmul.f32 %v623_v13, %v623_v13 }
  0xa7   :  { %v627_v19 = vsub.f32 %v37_v2, %v52_v16  ;;  %63 = vadd.xlane.f32.xlu0 %v59_v17  ;;  %v629_v20 = vsub.f32 %v39_v3, %v54_v18 }
  0xa9   :  { %v60_v22 = vmul.f32 %v627_v19, %v627_v19  ;;  %v62_v23 = vmul.f32 %v629_v20, %v629_v20 }
  0xab   :  { %67 = vadd.xlane.f32.xlu0 %v61_v21  ;;  %65 = vadd.xlane.f32.xlu1 %v60_v22 }
  0xaf   :  { %69 = vadd.xlane.f32.xlu1 %v62_v23 }
 0x134   :  { %v64_v45 = vpop.xlane.xlu0 %63 }
 0x135   :  { %v71_v46 = vmul.f32 0.0078125, %v64_v45 }
 0x137   :  { %v75_v47 = vadd.f32 1e-05, %v71_v46 }
 0x138   :  { %v66_v48 = vpop.xlane.xlu1 %65  ;;  %v68_v49 = vpop.xlane.xlu0 %67 }
 0x139   :  { %536 = vrsqrt.f32 %v75_v47  ;;  %v72_v50 = vmul.f32 0.0078125, %v66_v48  ;;  %v73_v51 = vmul.f32 0.0078125, %v68_v49 }
 0x13b   :  { %v76_v52 = vadd.f32 1e-05, %v72_v50  ;;  %v77_v53 = vadd.f32 1e-05, %v73_v51 }
 0x13c   :  { %v70_v54 = vpop.xlane.xlu1 %69 }
 0x13d   :  { %538 = vrsqrt.f32 %v76_v52  ;;  %v74_v55 = vmul.f32 0.0078125, %v70_v54 }
 0x13e   :  { %540 = vrsqrt.f32 %v77_v53 }
 0x13f   :  { %v78_v56 = vadd.f32 1e-05, %v74_v55 }
 0x141   :  { %542 = vrsqrt.f32 %v78_v56 }
 0x143   :  { %v537_v57 = vpop.eup %536 }
 0x144   :  { %v83_v58 = vmul.f32 %v537_v57, %v621_v12 }
 0x146   :  { %v93_v63 = vmul.f32 %v428_v59, %v83_v58 }
 0x147   :  { %v539_v60 = vpop.eup %538 }
 0x148   :  { %v541_v61 = vpop.eup %540  ;;  %v84_v62 = vmul.f32 %v539_v60, %v627_v19  ;;  %v103_v4 = vadd.f32 %v429_v0, %v93_v63 }
 0x149   :  { %v85_v1 = vmul.f32 %v541_v61, %v623_v13 }
 0x14a   :  { %v94_v2 = vmul.f32 %v428_v59, %v84_v62 }
 0x14b   :  { %v543_v3 = vpop.eup %542  ;;  %v95_v7 = vmul.f32 %v428_v59, %v85_v1 }
 0x14c   :  { %v104_v5 = vadd.f32 %v429_v0, %v94_v2  ;;  %v86_v6 = vmul.f32 %v543_v3, %v629_v20 }
 0x14d   :  { %v105_v10 = vadd.f32 %v429_v0, %v95_v7 }
 0x14e   :  { %v107_v8 = vpack.c.bf16 %v104_v5, %v103_v4  ;;  %v96_v9 = vmul.f32 %v428_v59, %v86_v6 }
 0x150   :  { %306 = vmatmul.mubr.bf16.vlgmr.msra.gmra.mrb[0].mxu0 %v107_v8  ;;  %496 = vmatprep.mubr.bf16.mxu1 %v107_v8  ;;  %v106_v11 = vadd.f32 %v429_v0, %v96_v9 }
 0x151   :  { %315 = vmatprep.mubr.bf16.mxu0 %v571_v39 }
 0x152   :  { %v108_v12 = vpack.c.bf16 %v106_v11, %v105_v10 }
 0x154   :  { %497 = vmatmul.mubr.bf16.vlgmr.msra.gmra.mrb[0].mxu1 %v108_v12 }
 0x158   :  { %316 = vmatmul.mubr.bf16.gmra.mrb[4].mxu0 %v108_v12 }
 0x223   :  { %v307_v14 = vpop.f32.mrb[0].mxu0 }
 0x224   :  { %v309_v15 = vpop.f32.mrb[1].mxu0 }
 0x225   :  { %v462_v13 = vpack.c.bf16 %v309_v15, %v307_v14  ;;  %v311_v16 = vpop.f32.mrb[2].mxu0 }
 0x226   :  { %v313_v17 = vpop.f32.mrb[3].mxu0 }
 0x227   :  { %415 = vst [vmem:[%s675_s4] sm:$0xff] %v462_v13  ;;  %v464_v18 = vpack.c.bf16 %v313_v17, %v311_v16  ;;  %v498_v19 = vpop.f32.mrb[0].mxu1 }
 0x228   :  { %v467_v20 = vpack.c.bf16 %v498_v19, %v498_v19  ;;  %v360_v21 = vpop.f32.mrb[1].mxu1 }
 0x229   :  { %417 = vst [vmem:[%s675_s4 + $0xc] sm:$0xff] %v464_v18  ;;  %v463_v22 = vpack.c.bf16 %v360_v21, %v360_v21  ;;  %v499_v23 = vpop.f32.mrb[2].mxu1 }
 0x22a   :  { %420 = vst [vmem:[%s675_s4 + $0x20] sm:$0xf] %v467_v20  ;;  %v469_v24 = vpack.c.bf16 %v499_v23, %v499_v23  ;;  %v363_v25 = vpop.f32.mrb[3].mxu1 }
 0x22b   :  { %416 = vst [vmem:[%s675_s4 + $0x8] sm:$0xf] %v463_v22  ;;  %v465_v26 = vpack.c.bf16 %v363_v25, %v363_v25  ;;  %v317_v27 = vpop.f32.mrb[4].mxu0 }
 0x22c   :  { %422 = vst [vmem:[%s675_s4 + $0x2c] sm:$0xf] %v469_v24  ;;  %v319_v28 = vpop.f32.mrb[5].mxu0 }
 0x22d   :  { %418 = vst [vmem:[%s675_s4 + $0x14] sm:$0xf] %v465_v26  ;;  %v466_v29 = vpack.c.bf16 %v319_v28, %v317_v27  ;;  %v321_v30 = vpop.f32.mrb[6].mxu0 }
 0x22e   :  { %v323_v31 = vpop.f32.mrb[7].mxu0 }
 0x22f   :  { %419 = vst [vmem:[%s675_s4 + $0x18] sm:$0xff] %v466_v29  ;;  %v468_v32 = vpack.c.bf16 %v323_v31, %v321_v30 }
 0x231   :  { %421 = vst [vmem:[%s675_s4 + $0x24] sm:$0xff] %v468_v32 }
 0x232   :  { %427 = vsyncpa [#allocation4], 1 }

// kernel: transformer_forward.12
= control target key start
LH: loop header
LB: loop body
LE: loop exit
PB: predicated region body
PF: predicated region fallthrough
CT: control target
= control target key end

     0   :  { %v653_v33 = vmov 0   ;;  %s866_s0 = inlined_call_operand.vmem [shape: f32[32,128], index: 0, kind: input, shape index: {}]   ;;  %s867_s3 = inlined_call_operand.vmem [shape: bf16[128,256], index: 3, kind: input, shape index: {}]   ;;  %s868_s5 = inlined_call_operand.vmem [shape: bf16[256,128], index: 5, kind: input, shape index: {}]   ;;  %s869_s1 = inlined_call_operand.vmem [shape: f32[1,128], index: 1, kind: input, shape index: {}]   ;;  %s870_s2 = inlined_call_operand.vmem [shape: f32[1,128], index: 2, kind: input, shape index: {}]   ;;  %s871_s4 = inlined_call_operand.vmem [shape: f32[1,256], index: 4, kind: input, shape index: {}]   ;;  %s872_s6 = inlined_call_operand.vmem [shape: f32[1,128], index: 6, kind: input, shape index: {}]   ;;  %s873_s7 = inlined_call_operand.vmem [shape: f32[32,128], index: 7, kind: output, shape index: {}]  }
   0x1   :  { %v697_v0 = vld [vmem:[%s866_s0] sm:$0xff]  ;;  %v702_v1 = vld [vmem:[%s866_s0 + $0x10] sm:$0xff]  ;;  %v709_v2 = vld [vmem:[%s866_s0 + $0x8] sm:$0xff]  ;;  %267 = vmatprep.mubr.bf16.mxu0 %v653_v33 }
   0x2   :  { %37 = vadd.xlane.f32.xlu0 %v697_v0  ;;  %41 = vadd.xlane.f32.xlu1 %v702_v1  ;;  %v714_v3 = vld [vmem:[%s866_s0 + $0x18] sm:$0xff]  ;;  %v589_v4 = vld [vmem:[%s867_s3 + $0x4] ss:$8 sps:$4 sm:$0xff]   ;;  %v591_v5 = vld [vmem:[%s867_s3] ss:$8 sps:$4 sm:$0xff]  }
   0x3   :  { %235 = vmatprep.subr.bf16.mxu0 %v589_v4  ;;  %v592_v6 = vld [vmem:[%s867_s3 + $0x14] ss:$8 sps:$4 sm:$0xff]   ;;  %v594_v23 = vld [vmem:[%s867_s3 + $0x10] ss:$8 sps:$4 sm:$0xff]   ;;  %v595_v24 = vld [vmem:[%s867_s3 + $0x24] ss:$8 sps:$4 sm:$0xff]  }
   0x4   :  { %236 = vmatpush1.bf16.msra.mxu0 %v591_v5  ;;  %v597_v25 = vld [vmem:[%s867_s3 + $0x20] ss:$8 sps:$4 sm:$0xff]   ;;  %v598_v26 = vld [vmem:[%s867_s3 + $0x34] ss:$8 sps:$4 sm:$0xff]   ;;  %v600_v27 = vld [vmem:[%s867_s3 + $0x30] ss:$8 sps:$4 sm:$0xff]  }
   0x5   :  { %237 = vmatprep.subr.bf16.mxu0 %v592_v6  ;;  %v601_v28 = vld [vmem:[%s867_s3 + $0x44] ss:$8 sps:$4 sm:$0xff]   ;;  %v603_v29 = vld [vmem:[%s867_s3 + $0x40] ss:$8 sps:$4 sm:$0xff]   ;;  %v604_v30 = vld [vmem:[%s867_s3 + $0x54] ss:$8 sps:$4 sm:$0xff]  }
   0x6   :  { %39 = vadd.xlane.f32.xlu0 %v709_v2  ;;  %43 = vadd.xlane.f32.xlu1 %v714_v3  ;;  %v606_v31 = vld [vmem:[%s867_s3 + $0x50] ss:$8 sps:$4 sm:$0xff]   ;;  %v607_v32 = vld [vmem:[%s867_s3 + $0x64] ss:$8 sps:$4 sm:$0xff]   ;;  %v609_v34 = vld [vmem:[%s867_s3 + $0x60] ss:$8 sps:$4 sm:$0xff]  }
   0x7   :  { %v610_v35 = vld [vmem:[%s867_s3 + $0x74] ss:$8 sps:$4 sm:$0xff]   ;;  %v612_v36 = vld [vmem:[%s867_s3 + $0x70] ss:$8 sps:$4 sm:$0xff]   ;;  %v613_v37 = vld [vmem:[%s868_s5 + $0x40] sm:$0xff]  }
   0x8   :  { %238 = vmatpush1.bf16.msra.mxu0 %v594_v23  ;;  %v614_v38 = vld [vmem:[%s868_s5] sm:$0xff]   ;;  %560 = vmatprep.subr.bf16.mxu1 %v613_v37  ;;  %v615_v39 = vld [vmem:[%s868_s5 + $0x48] sm:$0xff]   ;;  %v627_v23 = vld [vmem:[%s868_s5 + $0x78] sm:$0xff]  }
   0x9   :  { %239 = vmatprep.subr.bf16.mxu0 %v595_v24  ;;  %561 = vmatpush3.bf16.msra.mxu1 %v614_v38  ;;  %v616_v40 = vld [vmem:[%s868_s5 + $0x8] sm:$0xff]   ;;  %v525_v55 = vld [vmem:[%s869_s1] ss:$0 sm:$0xff]  ;;  %v628_v24 = vld [vmem:[%s868_s5 + $0x38] sm:$0xff]  }
   0xa   :  { %562 = vmatprep.subr.bf16.mxu1 %v615_v39  ;;  %v526_v60 = vld [vmem:[%s870_s2] ss:$0 sm:$0xff] }
   0xc   :  { %240 = vmatpush1.bf16.msra.mxu0 %v597_v25  ;;  %v145_v25 = vlaneseq }
   0xd   :  { %241 = vmatprep.subr.bf16.mxu0 %v598_v26  ;;  %563 = vmatpush3.bf16.msra.mxu1 %v616_v40 }
   0xe   :  { %v146_v26 = vshrl.u32 %v145_v25, 7 }
  0x10   :  { %242 = vmatpush1.bf16.msra.mxu0 %v600_v27  ;;  %v147_v27 = vsub.s32 0, %v146_v26 }
  0x11   :  { %243 = vmatprep.subr.bf16.mxu0 %v601_v28  ;;  %v143_v28 = vld [vmem:[%s871_s4] sm:$0x3] }
  0x14   :  { %244 = vmatpush1.bf16.msra.mxu0 %v603_v29  ;;  %v151_v29 = vsub.s32 1, %v146_v26 }
  0x15   :  { %245 = vmatprep.subr.bf16.mxu0 %v604_v30  ;;  %v148_v30 = vrot.slane %v143_v28, %v147_v27 }
  0x18   :  { %246 = vmatpush1.bf16.msra.mxu0 %v606_v31  ;;  %v152_v31 = vrot.slane %v143_v28, %v151_v29 }
  0x19   :  { %247 = vmatprep.subr.bf16.mxu0 %v607_v32 }
  0x1c   :  { %248 = vmatpush1.bf16.msra.mxu0 %v609_v34 }
  0x1d   :  { %249 = vmatprep.subr.bf16.mxu0 %v610_v35 }
  0x20   :  { %250 = vmatpush1.bf16.msra.mxu0 %v612_v36 }
  0x8f   :  { %v38_v7 = vpop.xlane.xlu0 %37  ;;  %v42_v8 = vpop.xlane.xlu1 %41 }
  0x90   :  { %v46_v9 = vmul.f32 0.0078125, %v38_v7  ;;  %v48_v10 = vmul.f32 0.0078125, %v42_v8 }
  0x92   :  { %v728_v11 = vsub.f32 %v697_v0, %v46_v9  ;;  %v731_v12 = vsub.f32 %v702_v1, %v48_v10 }
  0x93   :  { %v40_v13 = vpop.xlane.xlu0 %39  ;;  %v44_v14 = vpop.xlane.xlu1 %43 }
  0x94   :  { %v47_v15 = vmul.f32 0.0078125, %v40_v13  ;;  %v54_v16 = vmul.f32 %v728_v11, %v728_v11  ;;  %v49_v17 = vmul.f32 0.0078125, %v44_v14  ;;  %v56_v20 = vmul.f32 %v731_v12, %v731_v12  ;;  %v617_v14 = vld [vmem:[%s868_s5 + $0x50] sm:$0xff]  }
  0x95   :  { %564 = vmatprep.subr.bf16.mxu1 %v617_v14 }
  0x96   :  { %v736_v18 = vsub.f32 %v709_v2, %v47_v15  ;;  %58 = vadd.xlane.f32.xlu0 %v54_v16  ;;  %v739_v19 = vsub.f32 %v714_v3, %v49_v17  ;;  %v618_v15 = vld [vmem:[%s868_s5 + $0x10] sm:$0xff]   ;;  %v620_v16 = vld [vmem:[%s868_s5 + $0x18] sm:$0xff]   ;;  %v621_v17 = vld [vmem:[%s868_s5 + $0x60] sm:$0xff]  }
  0x97   :  { %565 = vmatpush3.bf16.msra.mxu1 %v618_v15 }
  0x98   :  { %v55_v21 = vmul.f32 %v736_v18, %v736_v18  ;;  %v57_v22 = vmul.f32 %v739_v19, %v739_v19 }
  0x9a   :  { %62 = vadd.xlane.f32.xlu0 %v56_v20  ;;  %60 = vadd.xlane.f32.xlu1 %v55_v21  ;;  %v624_v20 = vld [vmem:[%s868_s5 + $0x28] sm:$0xff]   ;;  %v625_v21 = vld [vmem:[%s868_s5 + $0x70] sm:$0xff]  }
  0x9e   :  { %64 = vadd.xlane.f32.xlu1 %v57_v22  ;;  %v626_v22 = vld [vmem:[%s868_s5 + $0x30] sm:$0xff]  }
 0x123   :  { %v59_v41 = vpop.xlane.xlu0 %58 }
 0x124   :  { %v66_v42 = vmul.f32 0.0078125, %v59_v41 }
 0x126   :  { %v70_v43 = vadd.f32 1e-05, %v66_v42 }
 0x127   :  { %v61_v44 = vpop.xlane.xlu1 %60  ;;  %v63_v45 = vpop.xlane.xlu0 %62 }
 0x128   :  { %629 = vrsqrt.f32 %v70_v43  ;;  %v67_v46 = vmul.f32 0.0078125, %v61_v44  ;;  %v68_v47 = vmul.f32 0.0078125, %v63_v45 }
 0x12a   :  { %v71_v48 = vadd.f32 1e-05, %v67_v46  ;;  %v72_v49 = vadd.f32 1e-05, %v68_v47 }
 0x12b   :  { %v65_v50 = vpop.xlane.xlu1 %64 }
 0x12c   :  { %631 = vrsqrt.f32 %v71_v48  ;;  %v69_v51 = vmul.f32 0.0078125, %v65_v50 }
 0x12d   :  { %633 = vrsqrt.f32 %v72_v49 }
 0x12e   :  { %v73_v52 = vadd.f32 1e-05, %v69_v51 }
 0x130   :  { %635 = vrsqrt.f32 %v73_v52 }
 0x132   :  { %v630_v53 = vpop.eup %629 }
 0x133   :  { %v78_v54 = vmul.f32 %v630_v53, %v728_v11 }
 0x135   :  { %v88_v58 = vmul.f32 %v525_v55, %v78_v54 }
 0x136   :  { %v632_v56 = vpop.eup %631 }
 0x137   :  { %v79_v57 = vmul.f32 %v632_v56, %v736_v18  ;;  %v634_v59 = vpop.eup %633  ;;  %v98_v63 = vadd.f32 %v526_v60, %v88_v58  ;;  %v622_v18 = vld [vmem:[%s868_s5 + $0x20] sm:$0xff]  }
 0x138   :  { %v80_v5 = vmul.f32 %v634_v59, %v731_v12  ;;  %v619_v12 = vld [vmem:[%s868_s5 + $0x58] sm:$0xff]  }
 0x139   :  { %v89_v61 = vmul.f32 %v525_v55, %v79_v57  ;;  %566 = vmatprep.subr.bf16.mxu1 %v619_v12 }
 0x13a   :  { %v636_v62 = vpop.eup %635  ;;  %v90_v9 = vmul.f32 %v525_v55, %v80_v5  ;;  %567 = vmatpush3.bf16.msra.mxu1 %v620_v16 }
 0x13b   :  { %v99_v4 = vadd.f32 %v526_v60, %v89_v61  ;;  %v81_v6 = vmul.f32 %v636_v62, %v739_v19  ;;  %568 = vmatprep.subr.bf16.mxu1 %v621_v17  ;;  %v623_v19 = vld [vmem:[%s868_s5 + $0x68] sm:$0xff]  }
 0x13c   :  { %v100_v11 = vadd.f32 %v526_v60, %v90_v9 }
 0x13d   :  { %v102_v7 = vpack.c.bf16 %v99_v4, %v98_v63  ;;  %v91_v8 = vmul.f32 %v525_v55, %v81_v6 }
 0x13e   :  { %569 = vmatpush3.bf16.msra.mxu1 %v622_v18 }
 0x13f   :  { %268 = vmatmul.mubr.bf16.vlgmr.msra.gmra.mrb[0].mxu0 %v102_v7  ;;  %v101_v10 = vadd.f32 %v526_v60, %v91_v8  ;;  %570 = vmatprep.subr.bf16.mxu1 %v623_v19 }
 0x140   :  { %277 = vmatprep.mubr.bf16.mxu0 %v653_v33 }
 0x141   :  { %v103_v13 = vpack.c.bf16 %v101_v10, %v100_v11 }
 0x142   :  { %571 = vmatpush3.bf16.msra.mxu1 %v624_v20 }
 0x143   :  { %572 = vmatprep.subr.bf16.mxu1 %v625_v21 }
 0x146   :  { %573 = vmatpush3.bf16.msra.mxu1 %v626_v22 }
 0x147   :  { %278 = vmatmul.mubr.bf16.gmra.mrb[4].mxu0 %v103_v13  ;;  %574 = vmatprep.subr.bf16.mxu1 %v627_v23 }
 0x14a   :  { %575 = vmatpush3.bf16.msra.mxu1 %v628_v24 }
 0x212   :  { %v269_v32 = vpop.f32.mrb[0].mxu0 }
 0x213   :  { %v270_v33 = vadd.f32 %v269_v32, %v148_v30  ;;  %v271_v34 = vpop.f32.mrb[1].mxu0  ;;  %v527_v32 = vld [vmem:[%s872_s6] ss:$0 sm:$0xff] }
 0x214   :  { %v272_v35 = vadd.f32 %v271_v34, %v152_v31  ;;  %v273_v36 = vpop.f32.mrb[2].mxu0  ;;  %v117_v34 = vadd.f32 %v527_v32, %v697_v0  ;;  %v119_v0 = vadd.f32 %v527_v32, %v702_v1 }
 0x215   :  { %v296_v37 = vmul.f32 0.70710677, %v270_v33  ;;  %v274_v38 = vadd.f32 %v273_v36, %v148_v30  ;;  %v275_v39 = vpop.f32.mrb[3].mxu0  ;;  %v288_v62 = vmul.f32 0.5, %v270_v33 }
 0x216   :  { %v297_v40 = vmul.f32 0.70710677, %v272_v35  ;;  %v276_v41 = vadd.f32 %v275_v39, %v152_v31  ;;  %v289_v5 = vmul.f32 0.5, %v272_v35 }
 0x217   :  { %637 = verf.f32 %v296_v37  ;;  %v298_v42 = vmul.f32 0.70710677, %v274_v38  ;;  %v290_v63 = vmul.f32 0.5, %v274_v38  ;;  %v118_v38 = vadd.f32 %v527_v32, %v709_v2 }
 0x218   :  { %639 = verf.f32 %v297_v40  ;;  %v299_v43 = vmul.f32 0.70710677, %v276_v41  ;;  %v291_v6 = vmul.f32 0.5, %v276_v41  ;;  %v120_v2 = vadd.f32 %v527_v32, %v714_v3 }
 0x219   :  { %641 = verf.f32 %v298_v42 }
 0x21a   :  { %643 = verf.f32 %v299_v43  ;;  %v279_v44 = vpop.f32.mrb[4].mxu0 }
 0x21b   :  { %v280_v45 = vadd.f32 %v279_v44, %v148_v30  ;;  %v281_v46 = vpop.f32.mrb[5].mxu0 }
 0x21c   :  { %v282_v47 = vadd.f32 %v281_v46, %v152_v31  ;;  %v283_v48 = vpop.f32.mrb[6].mxu0 }
 0x21d   :  { %v300_v49 = vmul.f32 0.70710677, %v280_v45  ;;  %v284_v50 = vadd.f32 %v283_v48, %v148_v30  ;;  %v285_v51 = vpop.f32.mrb[7].mxu0  ;;  %v292_v20 = vmul.f32 0.5, %v280_v45 }
 0x21e   :  { %v301_v52 = vmul.f32 0.70710677, %v282_v47  ;;  %v286_v53 = vadd.f32 %v285_v51, %v152_v31  ;;  %v293_v23 = vmul.f32 0.5, %v282_v47 }
 0x21f   :  { %645 = verf.f32 %v300_v49  ;;  %v302_v54 = vmul.f32 0.70710677, %v284_v50  ;;  %v294_v21 = vmul.f32 0.5, %v284_v50 }
 0x220   :  { %647 = verf.f32 %v301_v52  ;;  %v303_v55 = vmul.f32 0.70710677, %v286_v53  ;;  %v295_v24 = vmul.f32 0.5, %v286_v53 }
 0x221   :  { %v638_v56 = vpop.eup %637  ;;  %649 = verf.f32 %v302_v54 }
 0x222   :  { %v640_v57 = vpop.eup %639  ;;  %v312_v58 = vadd.f32 1.0, %v638_v56  ;;  %651 = verf.f32 %v303_v55 }
 0x223   :  { %v642_v59 = vpop.eup %641  ;;  %v313_v60 = vadd.f32 1.0, %v640_v57 }
 0x224   :  { %v644_v61 = vpop.eup %643  ;;  %v314_v4 = vadd.f32 1.0, %v642_v59  ;;  %v320_v8 = vmul.f32 %v312_v58, %v288_v62 }
 0x225   :  { %v315_v7 = vadd.f32 1.0, %v644_v61  ;;  %v321_v10 = vmul.f32 %v313_v60, %v289_v5 }
 0x226   :  { %v322_v9 = vmul.f32 %v314_v4, %v290_v63 }
 0x227   :  { %v323_v11 = vmul.f32 %v315_v7, %v291_v6 }
 0x228   :  { %v332_v13 = vpack.c.bf16 %v322_v9, %v320_v8 }
 0x229   :  { %v646_v14 = vpop.eup %645  ;;  %v333_v15 = vpack.c.bf16 %v323_v11, %v321_v10 }
 0x22a   :  { %v648_v12 = vpop.eup %647  ;;  %v316_v16 = vadd.f32 1.0, %v646_v14 }
 0x22b   :  { %v650_v17 = vpop.eup %649  ;;  %v317_v18 = vadd.f32 1.0, %v648_v12  ;;  %496 = vmatprep.mubr.bf16.mxu1 %v333_v15 }
 0x22c   :  { %v652_v19 = vpop.eup %651  ;;  %v318_v22 = vadd.f32 1.0, %v650_v17  ;;  %497 = vmatmul.mubr.bf16.vlgmr.msra.gmra.mrb[0].mxu1 %v332_v13  ;;  %v324_v26 = vmul.f32 %v316_v16, %v292_v20 }
 0x22d   :  { %v319_v25 = vadd.f32 1.0, %v652_v19  ;;  %v325_v28 = vmul.f32 %v317_v18, %v293_v23 }
 0x22e   :  { %v326_v27 = vmul.f32 %v318_v22, %v294_v21 }
 0x22f   :  { %v327_v29 = vmul.f32 %v319_v25, %v295_v24 }
 0x230   :  { %v334_v30 = vpack.c.bf16 %v326_v27, %v324_v26 }
 0x231   :  { %v335_v31 = vpack.c.bf16 %v327_v29, %v325_v28 }
 0x233   :  { %504 = vmatprep.mubr.bf16.mxu1 %v335_v31 }
 0x234   :  { %505 = vmatmul.mubr.bf16.gmra.mrb[4].mxu1 %v334_v30 }
 0x2ff   :  { %v576_v33 = vpop.f32.mrb[0].mxu1 }
 0x300   :  { %v577_v35 = vpop.f32.mrb[1].mxu1 }
 0x301   :  { %v578_v36 = vadd.f32 %v577_v35, %v576_v33  ;;  %v579_v37 = vpop.f32.mrb[2].mxu1 }
 0x302   :  { %v580_v39 = vpop.f32.mrb[3].mxu1 }
 0x303   :  { %v513_v40 = vadd.f32 %v578_v36, %v117_v34  ;;  %v581_v41 = vadd.f32 %v580_v39, %v579_v37 }
 0x305   :  { %517 = vst [vmem:[%s873_s7] sm:$0xff] %v513_v40  ;;  %v514_v42 = vadd.f32 %v581_v41, %v118_v38 }
 0x307   :  { %518 = vst [vmem:[%s873_s7 + $0x8] sm:$0xff] %v514_v42  ;;  %v582_v43 = vpop.f32.mrb[4].mxu1 }
 0x308   :  { %v583_v44 = vpop.f32.mrb[5].mxu1 }
 0x309   :  { %v584_v45 = vadd.f32 %v583_v44, %v582_v43  ;;  %v585_v46 = vpop.f32.mrb[6].mxu1 }
 0x30a   :  { %v586_v47 = vpop.f32.mrb[7].mxu1 }
 0x30b   :  { %v515_v48 = vadd.f32 %v584_v45, %v119_v0  ;;  %v587_v49 = vadd.f32 %v586_v47, %v585_v46 }
 0x30d   :  { %519 = vst [vmem:[%s873_s7 + $0x10] sm:$0xff] %v515_v48  ;;  %v516_v50 = vadd.f32 %v587_v49, %v120_v2 }
 0x30f   :  { %520 = vst [vmem:[%s873_s7 + $0x18] sm:$0xff] %v516_v50 }

// kernel: transformer_forward.17
= control target key start
LH: loop header
LB: loop body
LE: loop exit
PB: predicated region body
PF: predicated region fallthrough
CT: control target
= control target key end

     0   :  { %s196_s0 = inlined_call_operand.vmem [shape: f32[32,128], index: 0, kind: input, shape index: {}]   ;;  %s197_s1 = inlined_call_operand.vmem [shape: f32[1,128], index: 1, kind: input, shape index: {}]   ;;  %s198_s2 = inlined_call_operand.vmem [shape: f32[1,128], index: 2, kind: input, shape index: {}]   ;;  %s199_s3 = inlined_call_operand.hbm [shape: f32[32,128], index: 3, kind: output, shape index: {}]  }
   0x1   :  { %v15_v0 = vld [vmem:[%s196_s0] sm:$0xff]  ;;  %v17_v1 = vld [vmem:[%s196_s0 + $0x10] sm:$0xff] }
   0x2   :  { %21 = vadd.xlane.f32.xlu0 %v15_v0  ;;  %25 = vadd.xlane.f32.xlu1 %v17_v1 }
   0x3   :  { %8 = vsyncpa [#allocation3], 0  ;;  %v16_v2 = vld [vmem:[%s196_s0 + $0x8] sm:$0xff]  ;;  %v18_v3 = vld [vmem:[%s196_s0 + $0x18] sm:$0xff]  ;;  %s143_s23 = smov [#allocation2]  }
   0x4   :  { %v106_v33 = vld [vmem:[%s197_s1] ss:$0 sm:$0xff]  ;;  %s95_s1 = sshll.u32 %s143_s23, 4  ;;  %s96_s1 = int_to_ptr.vmem [resolvable:$true] %s95_s1 }
   0x5   :  { %v107_v35 = vld [vmem:[%s198_s2] ss:$0 sm:$0xff]  ;;  %s119_s2 = scalar_lea.vmem %s96_s1, 512  ;;  %p124_p1 = scmp.lt.s32.totalorder %s96_s1, %s96_s1 }
   0x6   :  { %23 = vadd.xlane.f32.xlu0 %v16_v2  ;;  %27 = vadd.xlane.f32.xlu1 %v18_v3  ;;  %p120_p0 = scmp.ne.s32.totalorder %s96_s1, %s119_s2  ;;  %p125_p2 = scmp.lt.s32.totalorder %s119_s2, %s119_s2 }
   0x8   :  { %p126_p3 = por %p125_p2, %p124_p1 }
   0xa   :  { %p127_p4 = pnand %p126_p3, %p120_p0 }
  0x8f   :  { %v22_v4 = vpop.xlane.xlu0 %21  ;;  %v26_v5 = vpop.xlane.xlu1 %25 }
  0x90   :  { %v30_v6 = vmul.f32 0.0078125, %v22_v4  ;;  %v32_v7 = vmul.f32 0.0078125, %v26_v5 }
  0x92   :  { %v34_v8 = vsub.f32 %v15_v0, %v30_v6  ;;  %v36_v9 = vsub.f32 %v17_v1, %v32_v7 }
  0x93   :  { %v24_v10 = vpop.xlane.xlu0 %23  ;;  %v28_v11 = vpop.xlane.xlu1 %27 }
  0x94   :  { %v31_v12 = vmul.f32 0.0078125, %v24_v10  ;;  %v38_v13 = vmul.f32 %v34_v8, %v34_v8  ;;  %v33_v14 = vmul.f32 0.0078125, %v28_v11  ;;  %v40_v17 = vmul.f32 %v36_v9, %v36_v9 }
  0x96   :  { %v35_v15 = vsub.f32 %v16_v2, %v31_v12  ;;  %42 = vadd.xlane.f32.xlu0 %v38_v13  ;;  %v37_v16 = vsub.f32 %v18_v3, %v33_v14 }
  0x98   :  { %v39_v18 = vmul.f32 %v35_v15, %v35_v15  ;;  %v41_v19 = vmul.f32 %v37_v16, %v37_v16 }
  0x9a   :  { %46 = vadd.xlane.f32.xlu0 %v40_v17  ;;  %44 = vadd.xlane.f32.xlu1 %v39_v18 }
  0x9e   :  { %48 = vadd.xlane.f32.xlu1 %v41_v19 }
 0x123   :  { %v43_v20 = vpop.xlane.xlu0 %42 }
 0x124   :  { %v50_v21 = vmul.f32 0.0078125, %v43_v20 }
 0x126   :  { %v54_v22 = vadd.f32 1e-05, %v50_v21 }
 0x127   :  { %v45_v23 = vpop.xlane.xlu1 %44  ;;  %v47_v24 = vpop.xlane.xlu0 %46 }
 0x128   :  { %111 = vrsqrt.f32 %v54_v22  ;;  %v51_v25 = vmul.f32 0.0078125, %v45_v23  ;;  %v52_v26 = vmul.f32 0.0078125, %v47_v24 }
 0x12a   :  { %v55_v27 = vadd.f32 1e-05, %v51_v25  ;;  %v56_v28 = vadd.f32 1e-05, %v52_v26 }
 0x12b   :  { %v49_v29 = vpop.xlane.xlu1 %48 }
 0x12c   :  { %113 = vrsqrt.f32 %v55_v27  ;;  %v53_v30 = vmul.f32 0.0078125, %v49_v29 }
 0x12d   :  { %115 = vrsqrt.f32 %v56_v28 }
 0x12e   :  { %v57_v31 = vadd.f32 1e-05, %v53_v30 }
 0x130   :  { %117 = vrsqrt.f32 %v57_v31 }
 0x132   :  { %v112_v32 = vpop.eup %111 }
 0x133   :  { %v62_v34 = vmul.f32 %v112_v32, %v34_v8 }
 0x135   :  { %v72_v36 = vmul.f32 %v106_v33, %v62_v34 }
 0x136   :  { %v114_v37 = vpop.eup %113 }
 0x137   :  { %v116_v38 = vpop.eup %115  ;;  %v63_v39 = vmul.f32 %v114_v37, %v35_v15  ;;  %v82_v40 = vadd.f32 %v107_v35, %v72_v36 }
 0x138   :  { %v64_v41 = vmul.f32 %v116_v38, %v36_v9 }
 0x139   :  { %v73_v42 = vmul.f32 %v106_v33, %v63_v39  ;;  %86 = vst [vmem:[#allocation2] sm:$0xff] %v82_v40 }
 0x13a   :  { %v118_v43 = vpop.eup %117  ;;  %v74_v44 = vmul.f32 %v106_v33, %v64_v41 }
 0x13b   :  { %v65_v45 = vmul.f32 %v118_v43, %v37_v16  ;;  %v83_v46 = vadd.f32 %v107_v35, %v73_v42 }
 0x13c   :  { %v84_v47 = vadd.f32 %v107_v35, %v74_v44 }
 0x13d   :  { %v75_v48 = vmul.f32 %v106_v33, %v65_v45  ;;  %87 = vst [vmem:[#allocation2 + $0x8] sm:$0xff] %v83_v46 }
 0x13e   :  { %88 = vst [vmem:[#allocation2 + $0x10] sm:$0xff] %v84_v47 }
 0x13f   :  { %v85_v49 = vadd.f32 %v107_v35, %v75_v48 }
 0x141   :  { %89 = vst [vmem:[#allocation2 + $0x18] sm:$0xff] %v85_v49 }
 0x142   :  { %130 = shalt.err (!%p127_p4)
}
 0x143   :  { %s131_s26 = scalar_lea.hbm %s199_s3, 512 }
 0x144   :  { %p132_p5 = scmp.ne.s32.totalorder %s199_s3, %s131_s26  ;;  %p135_p6 = scmp.lt.u32.totalorder %s131_s26, %s199_s3 }
 0x146   :  { %p137_p7 = pnand %p135_p6, %p132_p5 }
 0x148   :  { %140 = shalt.err (!%p137_p7)
}
 0x149   :  { %s144_s4 = smov 128   ;;  %s145_s5 = smov 8  }
 0x14a   :  { %101 = dma.vmem_to_hbm [thread:$0]  %s96_s1, 512, %s199_s3, [#allocation3], %s144_s4, %s144_s4, %s145_s5  }
 0x14b   :  { %141 = dma.done.wait [#allocation3], 512  }
 0x14c   :  { %142 = vsyncadd [#allocation3], 4294966784 }
 0x14d   :  { %105 = vsyncpa [#allocation3], 1 }

// kernel: transformer_forward.13
= control target key start
LH: loop header
LB: loop body
LE: loop exit
PB: predicated region body
PF: predicated region fallthrough
CT: control target
= control target key end

     0   :  { %v526_v39 = vmov 0   ;;  %s686_s0 = inlined_call_operand.vmem [shape: f32[32,128], index: 0, kind: input, shape index: {}]   ;;  %s687_s3 = inlined_call_operand.vmem [shape: bf16[128,384], index: 3, kind: input, shape index: {}]   ;;  %s688_s1 = inlined_call_operand.vmem [shape: f32[1,128], index: 1, kind: input, shape index: {}]   ;;  %s689_s2 = inlined_call_operand.vmem [shape: f32[1,128], index: 2, kind: input, shape index: {}]   ;;  %s690_s4 = inlined_call_operand.vmem [shape: bf16[32,384], index: 4, kind: output, shape index: {}]  }
   0x1   :  { %v22_v0 = vld [vmem:[%s686_s0] sm:$0xff]  ;;  %v24_v1 = vld [vmem:[%s686_s0 + $0x10] sm:$0xff]  ;;  %v23_v2 = vld [vmem:[%s686_s0 + $0x8] sm:$0xff]  ;;  %291 = vmatprep.mubr.bf16.mxu0 %v526_v39 }
   0x2   :  { %28 = vadd.xlane.f32.xlu0 %v22_v0  ;;  %32 = vadd.xlane.f32.xlu1 %v24_v1  ;;  %v25_v3 = vld [vmem:[%s686_s0 + $0x18] sm:$0xff]  ;;  %v486_v4 = vld [vmem:[%s687_s3 + $0x4] ss:$12 sps:$4 sm:$0xff]   ;;  %v488_v5 = vld [vmem:[%s687_s3] ss:$12 sps:$4 sm:$0xff]  }
   0x3   :  { %259 = vmatprep.subr.bf16.mxu0 %v486_v4  ;;  %v489_v6 = vld [vmem:[%s687_s3 + $0x1c] ss:$12 sps:$4 sm:$0xff]   ;;  %v492_v24 = vld [vmem:[%s687_s3 + $0x18] ss:$12 sps:$4 sm:$0xff]   ;;  %v493_v25 = vld [vmem:[%s687_s3 + $0x34] ss:$12 sps:$4 sm:$0xff]  }
   0x4   :  { %260 = vmatpush1.bf16.msra.mxu0 %v488_v5  ;;  %v491_v7 = vld [vmem:[%s687_s3 + $0x8] ss:$12 sps:$4 sm:$0xff]   ;;  %v495_v26 = vld [vmem:[%s687_s3 + $0x20] ss:$12 sps:$4 sm:$0xff]   ;;  %v496_v27 = vld [vmem:[%s687_s3 + $0x30] ss:$12 sps:$4 sm:$0xff]  }
   0x5   :  { %261 = vmatprep.subr.bf16.mxu0 %v489_v6  ;;  %465 = vmatprep.subr.bf16.mxu1 %v491_v7  ;;  %v497_v28 = vld [vmem:[%s687_s3 + $0x4c] ss:$12 sps:$4 sm:$0xff]   ;;  %v500_v30 = vld [vmem:[%s687_s3 + $0x48] ss:$12 sps:$4 sm:$0xff]   ;;  %v501_v31 = vld [vmem:[%s687_s3 + $0x64] ss:$12 sps:$4 sm:$0xff]  }
   0x6   :  { %30 = vadd.xlane.f32.xlu0 %v23_v2  ;;  %34 = vadd.xlane.f32.xlu1 %v25_v3  ;;  %v499_v29 = vld [vmem:[%s687_s3 + $0x38] ss:$12 sps:$4 sm:$0xff]   ;;  %v503_v32 = vld [vmem:[%s687_s3 + $0x50] ss:$12 sps:$4 sm:$0xff]   ;;  %v504_v33 = vld [vmem:[%s687_s3 + $0x60] ss:$12 sps:$4 sm:$0xff]  }
   0x7   :  { %466 = vmatpush3.bf16.msra.mxu1 %v491_v7  ;;  %v505_v34 = vld [vmem:[%s687_s3 + $0x7c] ss:$12 sps:$4 sm:$0xff]   ;;  %v508_v36 = vld [vmem:[%s687_s3 + $0x78] ss:$12 sps:$4 sm:$0xff]   ;;  %v509_v37 = vld [vmem:[%s687_s3 + $0x94] ss:$12 sps:$4 sm:$0xff]  }
   0x8   :  { %262 = vmatpush1.bf16.msra.mxu0 %v492_v24  ;;  %467 = vmatprep.subr.bf16.mxu1 %v495_v26  ;;  %v507_v35 = vld [vmem:[%s687_s3 + $0x68] ss:$12 sps:$4 sm:$0xff]   ;;  %v511_v38 = vld [vmem:[%s687_s3 + $0x80] ss:$12 sps:$4 sm:$0xff]   ;;  %v512_v40 = vld [vmem:[%s687_s3 + $0x90] ss:$12 sps:$4 sm:$0xff]  }
   0x9   :  { %263 = vmatprep.subr.bf16.mxu0 %v493_v25  ;;  %v513_v41 = vld [vmem:[%s687_s3 + $0xac] ss:$12 sps:$4 sm:$0xff]   ;;  %v516_v43 = vld [vmem:[%s687_s3 + $0xa8] ss:$12 sps:$4 sm:$0xff]   ;;  %v517_v44 = vld [vmem:[%s687_s3 + $0xb0] ss:$12 sps:$4 sm:$0xff]  }
   0xa   :  { %v515_v42 = vld [vmem:[%s687_s3 + $0x98] ss:$12 sps:$4 sm:$0xff]   ;;  %v413_v59 = vld [vmem:[%s688_s1] ss:$0 sm:$0xff] }
   0xb   :  { %468 = vmatpush3.bf16.msra.mxu1 %v495_v26 }
   0xc   :  { %264 = vmatpush1.bf16.msra.mxu0 %v496_v27  ;;  %469 = vmatprep.subr.bf16.mxu1 %v499_v29 }
   0xd   :  { %265 = vmatprep.subr.bf16.mxu0 %v497_v28 }
   0xf   :  { %470 = vmatpush3.bf16.msra.mxu1 %v499_v29 }
  0x10   :  { %266 = vmatpush1.bf16.msra.mxu0 %v500_v30  ;;  %471 = vmatprep.subr.bf16.mxu1 %v503_v32 }
  0x11   :  { %267 = vmatprep.subr.bf16.mxu0 %v501_v31 }
  0x13   :  { %472 = vmatpush3.bf16.msra.mxu1 %v503_v32 }
  0x14   :  { %268 = vmatpush1.bf16.msra.mxu0 %v504_v33  ;;  %473 = vmatprep.subr.bf16.mxu1 %v507_v35 }
  0x15   :  { %269 = vmatprep.subr.bf16.mxu0 %v505_v34 }
  0x17   :  { %474 = vmatpush3.bf16.msra.mxu1 %v507_v35 }
  0x18   :  { %270 = vmatpush1.bf16.msra.mxu0 %v508_v36  ;;  %475 = vmatprep.subr.bf16.mxu1 %v511_v38 }
  0x19   :  { %271 = vmatprep.subr.bf16.mxu0 %v509_v37 }
  0x1b   :  { %476 = vmatpush3.bf16.msra.mxu1 %v511_v38 }
  0x1c   :  { %272 = vmatpush1.bf16.msra.mxu0 %v512_v40  ;;  %477 = vmatprep.subr.bf16.mxu1 %v515_v42 }
  0x1d   :  { %273 = vmatprep.subr.bf16.mxu0 %v513_v41 }
  0x1f   :  { %478 = vmatpush3.bf16.msra.mxu1 %v515_v42 }
  0x20   :  { %274 = vmatpush1.bf16.msra.mxu0 %v516_v43  ;;  %479 = vmatprep.subr.bf16.mxu1 %v517_v44 }
  0x23   :  { %480 = vmatpush3.bf16.msra.mxu1 %v517_v44 }
  0x8f   :  { %v29_v8 = vpop.xlane.xlu0 %28  ;;  %v33_v9 = vpop.xlane.xlu1 %32 }
  0x90   :  { %v37_v10 = vmul.f32 0.0078125, %v29_v8  ;;  %v39_v11 = vmul.f32 0.0078125, %v33_v9 }
  0x92   :  { %v576_v12 = vsub.f32 %v22_v0, %v37_v10  ;;  %v578_v13 = vsub.f32 %v24_v1, %v39_v11  ;;  %v414_v0 = vld [vmem:[%s689_s2] ss:$0 sm:$0xff] }
  0x93   :  { %v31_v14 = vpop.xlane.xlu0 %30  ;;  %v35_v15 = vpop.xlane.xlu1 %34 }
  0x94   :  { %v38_v16 = vmul.f32 0.0078125, %v31_v14  ;;  %v45_v17 = vmul.f32 %v576_v12, %v576_v12  ;;  %v40_v18 = vmul.f32 0.0078125, %v35_v15  ;;  %v47_v21 = vmul.f32 %v578_v13, %v578_v13 }
  0x96   :  { %v582_v19 = vsub.f32 %v23_v2, %v38_v16  ;;  %49 = vadd.xlane.f32.xlu0 %v45_v17  ;;  %v584_v20 = vsub.f32 %v25_v3, %v40_v18 }
  0x98   :  { %v46_v22 = vmul.f32 %v582_v19, %v582_v19  ;;  %v48_v23 = vmul.f32 %v584_v20, %v584_v20 }
  0x9a   :  { %53 = vadd.xlane.f32.xlu0 %v47_v21  ;;  %51 = vadd.xlane.f32.xlu1 %v46_v22 }
  0x9e   :  { %55 = vadd.xlane.f32.xlu1 %v48_v23 }
 0x123   :  { %v50_v45 = vpop.xlane.xlu0 %49 }
 0x124   :  { %v57_v46 = vmul.f32 0.0078125, %v50_v45 }
 0x126   :  { %v61_v47 = vadd.f32 1e-05, %v57_v46 }
 0x127   :  { %v52_v48 = vpop.xlane.xlu1 %51  ;;  %v54_v49 = vpop.xlane.xlu0 %53 }
 0x128   :  { %518 = vrsqrt.f32 %v61_v47  ;;  %v58_v50 = vmul.f32 0.0078125, %v52_v48  ;;  %v59_v51 = vmul.f32 0.0078125, %v54_v49 }
 0x12a   :  { %v62_v52 = vadd.f32 1e-05, %v58_v50  ;;  %v63_v53 = vadd.f32 1e-05, %v59_v51 }
 0x12b   :  { %v56_v54 = vpop.xlane.xlu1 %55 }
 0x12c   :  { %520 = vrsqrt.f32 %v62_v52  ;;  %v60_v55 = vmul.f32 0.0078125, %v56_v54 }
 0x12d   :  { %522 = vrsqrt.f32 %v63_v53 }
 0x12e   :  { %v64_v56 = vadd.f32 1e-05, %v60_v55 }
 0x130   :  { %524 = vrsqrt.f32 %v64_v56 }
 0x132   :  { %v519_v57 = vpop.eup %518 }
 0x133   :  { %v69_v58 = vmul.f32 %v519_v57, %v576_v12 }
 0x135   :  { %v79_v63 = vmul.f32 %v413_v59, %v69_v58 }
 0x136   :  { %v521_v60 = vpop.eup %520 }
 0x137   :  { %v523_v61 = vpop.eup %522  ;;  %v70_v62 = vmul.f32 %v521_v60, %v582_v19  ;;  %v89_v4 = vadd.f32 %v414_v0, %v79_v63 }
 0x138   :  { %v71_v1 = vmul.f32 %v523_v61, %v578_v13 }
 0x139   :  { %v80_v2 = vmul.f32 %v413_v59, %v70_v62 }
 0x13a   :  { %v525_v3 = vpop.eup %524  ;;  %v81_v7 = vmul.f32 %v413_v59, %v71_v1 }
 0x13b   :  { %v90_v5 = vadd.f32 %v414_v0, %v80_v2  ;;  %v72_v6 = vmul.f32 %v525_v3, %v584_v20 }
 0x13c   :  { %v91_v10 = vadd.f32 %v414_v0, %v81_v7 }
 0x13d   :  { %v93_v8 = vpack.c.bf16 %v90_v5, %v89_v4  ;;  %v82_v9 = vmul.f32 %v413_v59, %v72_v6 }
 0x13f   :  { %292 = vmatmul.mubr.bf16.vlgmr.msra.gmra.mrb[0].mxu0 %v93_v8  ;;  %481 = vmatprep.mubr.bf16.mxu1 %v93_v8  ;;  %v92_v11 = vadd.f32 %v414_v0, %v82_v9 }
 0x140   :  { %301 = vmatprep.mubr.bf16.mxu0 %v526_v39 }
 0x141   :  { %v94_v12 = vpack.c.bf16 %v92_v11, %v91_v10 }
 0x143   :  { %482 = vmatmul.mubr.bf16.vlgmr.msra.gmra.mrb[0].mxu1 %v94_v12 }
 0x147   :  { %302 = vmatmul.mubr.bf16.gmra.mrb[4].mxu0 %v94_v12 }
 0x212   :  { %v293_v14 = vpop.f32.mrb[0].mxu0 }
 0x213   :  { %v295_v15 = vpop.f32.mrb[1].mxu0 }
 0x214   :  { %v447_v13 = vpack.c.bf16 %v295_v15, %v293_v14  ;;  %v297_v16 = vpop.f32.mrb[2].mxu0 }
 0x215   :  { %v299_v17 = vpop.f32.mrb[3].mxu0 }
 0x216   :  { %401 = vst [vmem:[%s690_s4] sm:$0xff] %v447_v13  ;;  %v449_v18 = vpack.c.bf16 %v299_v17, %v297_v16  ;;  %v483_v19 = vpop.f32.mrb[0].mxu1 }
 0x217   :  { %v452_v20 = vpack.c.bf16 %v483_v19, %v483_v19  ;;  %v346_v21 = vpop.f32.mrb[1].mxu1 }
 0x218   :  { %403 = vst [vmem:[%s690_s4 + $0xc] sm:$0xff] %v449_v18  ;;  %v448_v22 = vpack.c.bf16 %v346_v21, %v346_v21  ;;  %v484_v23 = vpop.f32.mrb[2].mxu1 }
 0x219   :  { %406 = vst [vmem:[%s690_s4 + $0x20] sm:$0xf] %v452_v20  ;;  %v454_v24 = vpack.c.bf16 %v484_v23, %v484_v23  ;;  %v349_v25 = vpop.f32.mrb[3].mxu1 }
 0x21a   :  { %402 = vst [vmem:[%s690_s4 + $0x8] sm:$0xf] %v448_v22  ;;  %v450_v26 = vpack.c.bf16 %v349_v25, %v349_v25  ;;  %v303_v27 = vpop.f32.mrb[4].mxu0 }
 0x21b   :  { %408 = vst [vmem:[%s690_s4 + $0x2c] sm:$0xf] %v454_v24  ;;  %v305_v28 = vpop.f32.mrb[5].mxu0 }
 0x21c   :  { %404 = vst [vmem:[%s690_s4 + $0x14] sm:$0xf] %v450_v26  ;;  %v451_v29 = vpack.c.bf16 %v305_v28, %v303_v27  ;;  %v307_v30 = vpop.f32.mrb[6].mxu0 }
 0x21d   :  { %v309_v31 = vpop.f32.mrb[7].mxu0 }
 0x21e   :  { %405 = vst [vmem:[%s690_s4 + $0x18] sm:$0xff] %v451_v29  ;;  %v453_v32 = vpack.c.bf16 %v309_v31, %v307_v30 }
 0x220   :  { %407 = vst [vmem:[%s690_s4 + $0x24] sm:$0xff] %v453_v32 }

</bundles_post_ra>
